<compile_context>
chip_gen: v7x
topology: tpu7x:2x2x1
jax: 0.10.0
libtpu: 0.0.40
codegen_flags: <defaults>
</compile_context>

<pallas_src>
import functools

import jax
import jax.numpy as jnp
from jax.experimental import pallas as pl
from jax.experimental.pallas import tpu as pltpu


# ---------------------------------------------------------------------------
# Fused multi-layer LSTM kernel (chunked over time, states carried in VMEM)
# ---------------------------------------------------------------------------
def _encoder_lstm_kernel(x_ref, w_ih0_ref, w_ih_ref, w_hh_ref, b_ref,
                         h_out_ref, c_out_ref,
                         seq_ref, gx_ref, h_state_ref, c_state_ref,
                         *, n_layers, hid_dim, chunk_len, batch, unroll):
    """One grid step = `chunk_len` timesteps through all `n_layers` layers.

    x_ref       : (Tc*B, E)            embedded input chunk (compute dtype)
    w_ih0_ref   : (E, 4H)              layer-0 input weights^T, cols [i,f,o,g]
    w_ih_ref    : (max(L-1,1), H, 4H)  layers>=1 input weights^T
    w_hh_ref    : (L, H, 4H)           recurrent weights^T
    b_ref       : (L, 1, 4H)           fused b_ih + b_hh (f32)
    h_out_ref   : (L, B, H)            final hidden state per layer (f32)
    c_out_ref   : (L, B, H)            final cell state per layer (f32)
    seq_ref     : (Tc*B, H)   VMEM     inter-layer activations (compute dtype)
    gx_ref      : (Tc*B, 4H)  VMEM     hoisted input-projection gates
    h_state_ref : (L, B, H)   VMEM     carried hidden state (f32)
    c_state_ref : (L, B, H)   VMEM     carried cell state (f32)
    """
    H, B, Tc = hid_dim, batch, chunk_len
    chunk = pl.program_id(0)

    @pl.when(chunk == 0)
    def _init_states():
        h_state_ref[...] = jnp.zeros_like(h_state_ref)
        c_state_ref[...] = jnp.zeros_like(c_state_ref)

    for layer in range(n_layers):               # static python loop (L small)
        last_layer = layer == n_layers - 1

        # ---- hoisted input projection: one big matmul per (layer, chunk) ---
        if layer == 0:
            x_in = x_ref[...]                           # (Tc*B, E)
            w_ih_t = w_ih0_ref[...]                     # (E, 4H)
        else:
            x_in = seq_ref[...]                         # (Tc*B, H)
            w_ih_t = w_ih_ref[layer - 1]                # (H, 4H)
        gx_ref[...] = (
            jnp.dot(x_in.astype(w_ih_t.dtype), w_ih_t,
                    preferred_element_type=jnp.float32)
            + b_ref[layer]).astype(gx_ref.dtype)        # (Tc*B, 4H)

        w_hh_t = w_hh_ref[layer]                        # (H, 4H), loop-invariant

        # ---- serial recurrence: only h @ W_hh^T on the critical path -------
        def step(t, carry, _last=last_layer, _w_hh_t=w_hh_t):
            h, c = carry
            row = pl.multiple_of(t * B, B)
            gates = gx_ref[pl.ds(row, B), :].astype(jnp.float32) + jnp.dot(
                h.astype(_w_hh_t.dtype), _w_hh_t,
                preferred_element_type=jnp.float32)     # (B, 4H) f32
            s = jax.nn.sigmoid(gates[:, :3 * H])        # [i | f | o]
            g = jnp.tanh(gates[:, 3 * H:])              # g
            c_new = s[:, H:2 * H] * c + s[:, :H] * g
            h_new = s[:, 2 * H:] * jnp.tanh(c_new)
            if not _last:                               # feed next layer
                seq_ref[pl.ds(row, B), :] = h_new.astype(seq_ref.dtype)
            return h_new, c_new

        h0 = h_state_ref[layer]                         # carried from prev chunk
        c0 = c_state_ref[layer]
        h_t, c_t = jax.lax.fori_loop(0, Tc, step, (h0, c0), unroll=unroll)

        h_state_ref[layer] = h_t
        c_state_ref[layer] = c_t

    @pl.when(chunk == pl.num_programs(0) - 1)
    def _finalize():
        h_out_ref[...] = h_state_ref[...]
        c_out_ref[...] = c_state_ref[...]


def _pick_chunk_len(seq_len, max_chunk=32):
    """Largest divisor of seq_len that is <= max_chunk."""
    for c in range(min(seq_len, max_chunk), 0, -1):
        if seq_len % c == 0:
            return c
    return seq_len


def encoder_lstm_pallas(x_emb, packed, *, chunk_len=None):
    """x_emb: (T, B, E) embedded tokens -> (hidden, cell), each (L, B, H)."""
    T, B, E = x_emb.shape
    w_hh_t = packed["w_hh_t"]
    L, H, _ = w_hh_t.shape
    cdtype = w_hh_t.dtype
    csize = w_hh_t.dtype.itemsize

    if chunk_len is None:
        chunk_len = _pick_chunk_len(T)
    assert T % chunk_len == 0, "chunk_len must divide seq_len"
    Tc = chunk_len
    n_chunks = T // Tc

    # Pre-reshape / cast in XLA (free, lane-dense 2-D operand for the kernel).
    x2d = x_emb.reshape(T * B, E).astype(cdtype)

    # ---- VMEM budget (double-buffered inputs/outputs + scratch) + headroom --
    w_ih_rest_rows = packed["w_ih_rest_t"].shape[0] * packed["w_ih_rest_t"].shape[1]
    vmem_bytes = (
        2 * Tc * B * E * csize                                   # x chunk
        + 2 * (E * 4 * H + w_ih_rest_rows * 4 * H + L * H * 4 * H) * csize
        + 2 * L * 4 * H * 4                                      # bias (f32)
        + 2 * 2 * L * B * H * 4                                  # h/c outputs
        + Tc * B * H * csize + Tc * B * 4 * H * csize            # seq + gx
        + 2 * L * B * H * 4)                                     # state scratch
    vmem_limit = int(min(max(int(vmem_bytes * 1.5) + (4 << 20), 32 << 20),
                         64 << 20))

    kernel = functools.partial(
        _encoder_lstm_kernel, n_layers=L, hid_dim=H, chunk_len=Tc, batch=B,
        unroll=min(8, Tc))

    const3 = lambda k: (0, 0, 0)
    hidden, cell = pl.pallas_call(
        kernel,
        out_shape=(
            jax.ShapeDtypeStruct((L, B, H), jnp.float32),
            jax.ShapeDtypeStruct((L, B, H), jnp.float32),
        ),
        grid_spec=pltpu.PrefetchScalarGridSpec(
            num_scalar_prefetch=0,
            grid=(n_chunks,),
            in_specs=[
                pl.BlockSpec((Tc * B, E), lambda k: (k, 0)),     # streamed x
                pl.BlockSpec(packed["w_ih0_t"].shape, lambda k: (0, 0)),
                pl.BlockSpec(packed["w_ih_rest_t"].shape, const3),
                pl.BlockSpec(packed["w_hh_t"].shape, const3),
                pl.BlockSpec(packed["bias"].shape, const3),
            ],
            out_specs=(
                pl.BlockSpec((L, B, H), const3),
                pl.BlockSpec((L, B, H), const3),
            ),
            scratch_shapes=[
                pltpu.VMEM((Tc * B, H), cdtype),         # inter-layer sequence
                pltpu.VMEM((Tc * B, 4 * H), cdtype),     # hoisted input gates
                pltpu.VMEM((L, B, H), jnp.float32),      # carried hidden state
                pltpu.VMEM((L, B, H), jnp.float32),      # carried cell state
            ],
        ),
        compiler_params=pltpu.CompilerParams(
            dimension_semantics=("arbitrary",),
            vmem_limit_bytes=vmem_limit),
    )(x2d, packed["w_ih0_t"], packed["w_ih_rest_t"],
      packed["w_hh_t"], packed["bias"])
    return hidden, cell


# ---------------------------------------------------------------------------
# Parameter init (PyTorch layout) and one-time packing for the kernel
# ---------------------------------------------------------------------------
def init_encoder_params(key, input_dim, emb_dim, hid_dim, n_layers):
    params = {}
    k_emb, key = jax.random.split(key)
    params["embedding"] = jax.random.normal(
        k_emb, (input_dim, emb_dim), jnp.float32)
    stdv = 1.0 / jnp.sqrt(hid_dim)
    layers = []
    for layer in range(n_layers):
        d_in = emb_dim if layer == 0 else hid_dim
        keys = jax.random.split(jax.random.fold_in(key, layer), 4)
        layers.append({
            "w_ih": jax.random.uniform(keys[0], (4 * hid_dim, d_in),
                                       jnp.float32, -stdv, stdv),
            "w_hh": jax.random.uniform(keys[1], (4 * hid_dim, hid_dim),
                                       jnp.float32, -stdv, stdv),
            "b_ih": jax.random.uniform(keys[2], (4 * hid_dim,),
                                       jnp.float32, -stdv, stdv),
            "b_hh": jax.random.uniform(keys[3], (4 * hid_dim,),
                                       jnp.float32, -stdv, stdv),
        })
    params["lstm"] = layers
    return params


def pack_encoder_params(raw, *, hid_dim, compute_dtype=jnp.float32):
    """Transpose / reorder [i,f,g,o]->[i,f,o,g] / fuse biases once, up front."""
    H = hid_dim

    def reorder(w_t):                     # (..., 4H) cols [i,f,g,o] -> [i,f,o,g]
        i, f, g, o = (w_t[..., 0:H], w_t[..., H:2 * H],
                      w_t[..., 2 * H:3 * H], w_t[..., 3 * H:])
        return jnp.concatenate([i, f, o, g], axis=-1)

    layers = raw["lstm"]
    L = len(layers)
    w_ih0_t = reorder(layers[0]["w_ih"].T).astype(compute_dtype)       # (E,4H)
    if L > 1:
        w_ih_rest_t = jnp.stack(
            [reorder(lp["w_ih"].T) for lp in layers[1:]]).astype(compute_dtype)
    else:
        # Tiny dummy (never read) so the kernel signature stays fixed for L==1.
        w_ih_rest_t = jnp.zeros((1, 8, 128), compute_dtype)
    w_hh_t = jnp.stack(
        [reorder(lp["w_hh"].T) for lp in layers]).astype(compute_dtype)
    bias = jnp.stack(
        [reorder((lp["b_ih"] + lp["b_hh"]).reshape(1, 4 * H))
         for lp in layers]).astype(jnp.float32)                        # (L,1,4H)
    return {
        "embedding": raw["embedding"],
        "w_ih0_t": w_ih0_t,
        "w_ih_rest_t": w_ih_rest_t,
        "w_hh_t": w_hh_t,
        "bias": bias,
    }


# ---------------------------------------------------------------------------
# Encoder forward (embedding gather is plain-JAX glue)
# ---------------------------------------------------------------------------
@functools.partial(jax.jit, static_argnames=("chunk_len",))
def encoder_forward(packed, src, *, chunk_len=None):
    """src: (T, B) int32 tokens -> (hidden, cell), each (n_layers, B, H)."""
    # TODO(synk): dropout omitted — nn.Dropout and the LSTM inter-layer dropout
    # are identity in eval mode; training-mode dropout is stochastic.
    emb = jnp.take(packed["embedding"], src, axis=0)          # (T, B, E)
    return encoder_lstm_pallas(emb, packed, chunk_len=chunk_len)


# ---------------------------------------------------------------------------
# Pure-JAX reference (PyTorch-layout weights) for the correctness check
# ---------------------------------------------------------------------------
def _lstm_layer_ref(x, w_ih, w_hh, b_ih, b_hh, hid_dim):
    T, B, _ = x.shape
    H = hid_dim
    hp = jax.lax.Precision.HIGHEST

    def step(carry, x_t):
        h, c = carry
        gates = (jnp.dot(x_t, w_ih.T, precision=hp)
                 + jnp.dot(h, w_hh.T, precision=hp) + b_ih + b_hh)
        i_g = jax.nn.sigmoid(gates[:, 0 * H:1 * H])
        f_g = jax.nn.sigmoid(gates[:, 1 * H:2 * H])
        g_g = jnp.tanh(gates[:, 2 * H:3 * H])
        o_g = jax.nn.sigmoid(gates[:, 3 * H:4 * H])
        c_new = f_g * c + i_g * g_g
        h_new = o_g * jnp.tanh(c_new)
        return (h_new, c_new), h_new

    init = (jnp.zeros((B, H), jnp.float32), jnp.zeros((B, H), jnp.float32))
    (h_T, c_T), out = jax.lax.scan(step, init, x)
    return out, h_T, c_T


def encoder_forward_ref(params, src, hid_dim):
    x = jnp.take(params["embedding"], src, axis=0)
    hiddens, cells = [], []
    for lp in params["lstm"]:
        x, h_last, c_last = _lstm_layer_ref(
            x, lp["w_ih"], lp["w_hh"], lp["b_ih"], lp["b_hh"], hid_dim)
        hiddens.append(h_last)
        cells.append(c_last)
    return jnp.stack(hiddens, 0), jnp.stack(cells, 0)


# ---------------------------------------------------------------------------
if __name__ == "__main__":
    # Small, TPU-friendly shapes consistent with the module's forward
    # (time-major (T, B) token ids); H=128 keeps gate slices lane-aligned,
    # B=8 keeps the (Tc*B, ·) row slices sublane-aligned for f32.
    INPUT_DIM = 100
    EMB_DIM = 128
    HID_DIM = 128
    N_LAYERS = 2
    SEQ_LEN = 8
    BATCH = 8
    CHUNK_LEN = 4          # exercises the multi-chunk carried-state path

    key = jax.random.PRNGKey(0)
    k_param, k_src = jax.random.split(key)

    raw = init_encoder_params(k_param, INPUT_DIM, EMB_DIM, HID_DIM, N_LAYERS)
    # NOTE: at production scale on v6e/v7x, pass compute_dtype=jnp.bfloat16
    # (MXU-native matmuls, half the weight/activation VMEM & DMA); f32 here so
    # the numerical check against the reference stays tight.
    packed = pack_encoder_params(raw, hid_dim=HID_DIM)

    src = jax.random.randint(k_src, (SEQ_LEN, BATCH), 1, INPUT_DIM,
                             dtype=jnp.int32)

    hidden, cell = encoder_forward(packed, src, chunk_len=CHUNK_LEN)
    hidden = jax.block_until_ready(hidden)
    cell = jax.block_until_ready(cell)

    hidden_ref, cell_ref = encoder_forward_ref(raw, src, HID_DIM)

    assert hidden.shape == (N_LAYERS, BATCH, HID_DIM)
    assert cell.shape == (N_LAYERS, BATCH, HID_DIM)
    assert jnp.allclose(hidden, hidden_ref, atol=1e-3, rtol=1e-3)
    assert jnp.allclose(cell, cell_ref, atol=1e-3, rtol=1e-3)

    print("KERNEL_OK")
</pallas_src>

<mosaic_0001>
module attributes {stable_mosaic.version = 11 : i64} {
  func.func @_encoder_lstm_kernel(%arg0: i32, %arg1: memref<32x128xf32, #tpu.memory_space<vmem>>, %arg2: memref<128x512xf32, #tpu.memory_space<vmem>>, %arg3: memref<1x128x512xf32, #tpu.memory_space<vmem>>, %arg4: memref<2x128x512xf32, #tpu.memory_space<vmem>>, %arg5: memref<2x1x512xf32, #tpu.memory_space<vmem>>, %arg6: memref<2x8x128xf32, #tpu.memory_space<vmem>>, %arg7: memref<2x8x128xf32, #tpu.memory_space<vmem>>, %arg8: memref<32x128xf32, #tpu.memory_space<vmem>>, %arg9: memref<32x512xf32, #tpu.memory_space<vmem>>, %arg10: memref<2x8x128xf32, #tpu.memory_space<vmem>>, %arg11: memref<2x8x128xf32, #tpu.memory_space<vmem>>) attributes {dimension_semantics = [#tpu.dimension_semantics<arbitrary>], iteration_bounds = array<i64: 2>, scalar_prefetch = 0 : i64, scratch_operands = 4 : i64, tpu.core_type = #tpu.core_type<tc>, window_params = [{transform_indices = @transform_0, window_bounds = array<i64: 32, 128>}, {pipeline_mode = #tpu.pipeline_mode<synchronous>, transform_indices = @transform_1, window_bounds = array<i64: 128, 512>}, {pipeline_mode = #tpu.pipeline_mode<synchronous>, transform_indices = @transform_2, window_bounds = array<i64: 1, 128, 512>}, {pipeline_mode = #tpu.pipeline_mode<synchronous>, transform_indices = @transform_3, window_bounds = array<i64: 2, 128, 512>}, {pipeline_mode = #tpu.pipeline_mode<synchronous>, transform_indices = @transform_4, window_bounds = array<i64: 2, 1, 512>}, {pipeline_mode = #tpu.pipeline_mode<synchronous>, transform_indices = @transform_5, window_bounds = array<i64: 2, 8, 128>}, {pipeline_mode = #tpu.pipeline_mode<synchronous>, transform_indices = @transform_6, window_bounds = array<i64: 2, 8, 128>}]} {
    %c0_i32 = arith.constant 0 : i32
    %0 = arith.cmpi eq, %arg0, %c0_i32 : i32
    %1 = arith.extui %0 : i1 to i32
    %c0_i32_0 = arith.constant 0 : i32
    %2 = arith.cmpi ne, %1, %c0_i32_0 : i32
    scf.if %2 {
      %cst_92 = arith.constant 0.000000e+00 : f32
      %231 = vector.broadcast %cst_92 : f32 to vector<2x8x128xf32>
      %c0_93 = arith.constant 0 : index
      %c0_94 = arith.constant 0 : index
      %c0_95 = arith.constant 0 : index
      %232 = vector.load %arg10[%c0_93, %c0_94, %c0_95] : memref<2x8x128xf32, #tpu.memory_space<vmem>>, vector<2x8x128xf32>
      tpu.vector_store %arg10[%c0_93, %c0_94, %c0_95], %231 {strides = array<i32>} : memref<2x8x128xf32, #tpu.memory_space<vmem>>, vector<2x8x128xf32>,
      %cst_96 = arith.constant 0.000000e+00 : f32
      %233 = vector.broadcast %cst_96 : f32 to vector<2x8x128xf32>
      %c0_97 = arith.constant 0 : index
      %c0_98 = arith.constant 0 : index
      %c0_99 = arith.constant 0 : index
      %234 = vector.load %arg11[%c0_97, %c0_98, %c0_99] : memref<2x8x128xf32, #tpu.memory_space<vmem>>, vector<2x8x128xf32>
      tpu.vector_store %arg11[%c0_97, %c0_98, %c0_99], %233 {strides = array<i32>} : memref<2x8x128xf32, #tpu.memory_space<vmem>>, vector<2x8x128xf32>,
    } else {
    }
    %c0 = arith.constant 0 : index
    %c0_1 = arith.constant 0 : index
    %3 = vector.load %arg1[%c0, %c0_1] : memref<32x128xf32, #tpu.memory_space<vmem>>, vector<32x128xf32>
    %c0_2 = arith.constant 0 : index
    %c0_3 = arith.constant 0 : index
    %4 = vector.load %arg2[%c0_2, %c0_3] : memref<128x512xf32, #tpu.memory_space<vmem>>, vector<128x512xf32>
    %cst = arith.constant dense<0.000000e+00> : vector<32x512xf32>
    %5 = tpu.matmul %3, %4, %cst {dimension_numbers = #tpu.dot_dimension_numbers<[1], [0], [0], [1], [0, 0, 1, 1], [], []>} : vector<32x128xf32>, vector<128x512xf32>, vector<32x512xf32> -> vector<32x512xf32>
    %c0_4 = arith.constant 0 : index
    %c0_5 = arith.constant 0 : index
    %c0_6 = arith.constant 0 : index
    %6 = vector.load %arg5[%c0_4, %c0_5, %c0_6] : memref<2x1x512xf32, #tpu.memory_space<vmem>>, vector<1x1x512xf32>
    %7 = vector.shape_cast %6 : vector<1x1x512xf32> to vector<1x512xf32>
    %8 = vector.broadcast %7 : vector<1x512xf32> to vector<32x512xf32>
    %9 = arith.addf %5, %8 : vector<32x512xf32>
    %c0_7 = arith.constant 0 : index
    %c0_8 = arith.constant 0 : index
    %10 = vector.load %arg9[%c0_7, %c0_8] : memref<32x512xf32, #tpu.memory_space<vmem>>, vector<32x512xf32>
    tpu.vector_store %arg9[%c0_7, %c0_8], %9 {strides = array<i32>} : memref<32x512xf32, #tpu.memory_space<vmem>>, vector<32x512xf32>,
    %c0_9 = arith.constant 0 : index
    %c0_10 = arith.constant 0 : index
    %c0_11 = arith.constant 0 : index
    %11 = vector.load %arg4[%c0_9, %c0_10, %c0_11] : memref<2x128x512xf32, #tpu.memory_space<vmem>>, vector<1x128x512xf32>
    %12 = vector.shape_cast %11 : vector<1x128x512xf32> to vector<128x512xf32>
    %c0_12 = arith.constant 0 : index
    %c0_13 = arith.constant 0 : index
    %c0_14 = arith.constant 0 : index
    %13 = vector.load %arg10[%c0_12, %c0_13, %c0_14] : memref<2x8x128xf32, #tpu.memory_space<vmem>>, vector<1x8x128xf32>
    %14 = vector.shape_cast %13 : vector<1x8x128xf32> to vector<8x128xf32>
    %c0_15 = arith.constant 0 : index
    %c0_16 = arith.constant 0 : index
    %c0_17 = arith.constant 0 : index
    %15 = vector.load %arg11[%c0_15, %c0_16, %c0_17] : memref<2x8x128xf32, #tpu.memory_space<vmem>>, vector<1x8x128xf32>
    %16 = vector.shape_cast %15 : vector<1x8x128xf32> to vector<8x128xf32>
    %c0_i32_18 = arith.constant 0 : i32
    %c8_i32 = arith.constant 8 : i32
    %17 = arith.muli %c0_i32_18, %c8_i32 : i32
    %18 = tpu.assume_multiple %17, 8 : i32
    %19 = arith.index_cast %18 : i32 to index
    %c0_19 = arith.constant 0 : index
    %20 = vector.load %arg9[%19, %c0_19] : memref<32x512xf32, #tpu.memory_space<vmem>>, vector<8x512xf32>
    %cst_20 = arith.constant dense<0.000000e+00> : vector<8x512xf32>
    %21 = tpu.matmul %14, %12, %cst_20 {dimension_numbers = #tpu.dot_dimension_numbers<[1], [0], [0], [1], [0, 0, 1, 1], [], []>} : vector<8x128xf32>, vector<128x512xf32>, vector<8x512xf32> -> vector<8x512xf32>
    %22 = arith.addf %20, %21 : vector<8x512xf32>
    %23 = vector.extract_strided_slice %22 {offsets = [0, 0], sizes = [8, 384], strides = [1, 1]} : vector<8x512xf32> to vector<8x384xf32>
    %24 = arith.negf %23 : vector<8x384xf32>
    %25 = math.exp %24 : vector<8x384xf32>
    %cst_21 = arith.constant 1.000000e+00 : f32
    %26 = vector.broadcast %cst_21 : f32 to vector<8x384xf32>
    %27 = arith.addf %26, %25 : vector<8x384xf32>
    %28 = arith.divf %26, %27 : vector<8x384xf32>
    %29 = vector.extract_strided_slice %22 {offsets = [0, 384], sizes = [8, 128], strides = [1, 1]} : vector<8x512xf32> to vector<8x128xf32>
    %30 = math.tanh %29 : vector<8x128xf32>
    %31 = vector.extract_strided_slice %28 {offsets = [0, 128], sizes = [8, 128], strides = [1, 1]} : vector<8x384xf32> to vector<8x128xf32>
    %32 = arith.mulf %31, %16 : vector<8x128xf32>
    %33 = vector.extract_strided_slice %28 {offsets = [0, 0], sizes = [8, 128], strides = [1, 1]} : vector<8x384xf32> to vector<8x128xf32>
    %34 = arith.mulf %33, %30 : vector<8x128xf32>
    %35 = arith.addf %32, %34 : vector<8x128xf32>
    %36 = vector.extract_strided_slice %28 {offsets = [0, 256], sizes = [8, 128], strides = [1, 1]} : vector<8x384xf32> to vector<8x128xf32>
    %37 = math.tanh %35 : vector<8x128xf32>
    %38 = arith.mulf %36, %37 : vector<8x128xf32>
    %39 = arith.index_cast %18 : i32 to index
    %c0_22 = arith.constant 0 : index
    %40 = vector.load %arg8[%39, %c0_22] : memref<32x128xf32, #tpu.memory_space<vmem>>, vector<8x128xf32>
    tpu.vector_store %arg8[%39, %c0_22], %38 {strides = array<i32>} : memref<32x128xf32, #tpu.memory_space<vmem>>, vector<8x128xf32>,
    %c1_i32 = arith.constant 1 : i32
    %c8_i32_23 = arith.constant 8 : i32
    %41 = arith.muli %c1_i32, %c8_i32_23 : i32
    %42 = tpu.assume_multiple %41, 8 : i32
    %43 = arith.index_cast %42 : i32 to index
    %c0_24 = arith.constant 0 : index
    %44 = vector.load %arg9[%43, %c0_24] : memref<32x512xf32, #tpu.memory_space<vmem>>, vector<8x512xf32>
    %cst_25 = arith.constant dense<0.000000e+00> : vector<8x512xf32>
    %45 = tpu.matmul %38, %12, %cst_25 {dimension_numbers = #tpu.dot_dimension_numbers<[1], [0], [0], [1], [0, 0, 1, 1], [], []>} : vector<8x128xf32>, vector<128x512xf32>, vector<8x512xf32> -> vector<8x512xf32>
    %46 = arith.addf %44, %45 : vector<8x512xf32>
    %47 = vector.extract_strided_slice %46 {offsets = [0, 0], sizes = [8, 384], strides = [1, 1]} : vector<8x512xf32> to vector<8x384xf32>
    %48 = arith.negf %47 : vector<8x384xf32>
    %49 = math.exp %48 : vector<8x384xf32>
    %cst_26 = arith.constant 1.000000e+00 : f32
    %50 = vector.broadcast %cst_26 : f32 to vector<8x384xf32>
    %51 = arith.addf %50, %49 : vector<8x384xf32>
    %52 = arith.divf %50, %51 : vector<8x384xf32>
    %53 = vector.extract_strided_slice %46 {offsets = [0, 384], sizes = [8, 128], strides = [1, 1]} : vector<8x512xf32> to vector<8x128xf32>
    %54 = math.tanh %53 : vector<8x128xf32>
    %55 = vector.extract_strided_slice %52 {offsets = [0, 128], sizes = [8, 128], strides = [1, 1]} : vector<8x384xf32> to vector<8x128xf32>
    %56 = arith.mulf %55, %35 : vector<8x128xf32>
    %57 = vector.extract_strided_slice %52 {offsets = [0, 0], sizes = [8, 128], strides = [1, 1]} : vector<8x384xf32> to vector<8x128xf32>
    %58 = arith.mulf %57, %54 : vector<8x128xf32>
    %59 = arith.addf %56, %58 : vector<8x128xf32>
    %60 = vector.extract_strided_slice %52 {offsets = [0, 256], sizes = [8, 128], strides = [1, 1]} : vector<8x384xf32> to vector<8x128xf32>
    %61 = math.tanh %59 : vector<8x128xf32>
    %62 = arith.mulf %60, %61 : vector<8x128xf32>
    %63 = arith.index_cast %42 : i32 to index
    %c0_27 = arith.constant 0 : index
    %64 = vector.load %arg8[%63, %c0_27] : memref<32x128xf32, #tpu.memory_space<vmem>>, vector<8x128xf32>
    tpu.vector_store %arg8[%63, %c0_27], %62 {strides = array<i32>} : memref<32x128xf32, #tpu.memory_space<vmem>>, vector<8x128xf32>,
    %c2_i32 = arith.constant 2 : i32
    %c8_i32_28 = arith.constant 8 : i32
    %65 = arith.muli %c2_i32, %c8_i32_28 : i32
    %66 = tpu.assume_multiple %65, 8 : i32
    %67 = arith.index_cast %66 : i32 to index
    %c0_29 = arith.constant 0 : index
    %68 = vector.load %arg9[%67, %c0_29] : memref<32x512xf32, #tpu.memory_space<vmem>>, vector<8x512xf32>
    %cst_30 = arith.constant dense<0.000000e+00> : vector<8x512xf32>
    %69 = tpu.matmul %62, %12, %cst_30 {dimension_numbers = #tpu.dot_dimension_numbers<[1], [0], [0], [1], [0, 0, 1, 1], [], []>} : vector<8x128xf32>, vector<128x512xf32>, vector<8x512xf32> -> vector<8x512xf32>
    %70 = arith.addf %68, %69 : vector<8x512xf32>
    %71 = vector.extract_strided_slice %70 {offsets = [0, 0], sizes = [8, 384], strides = [1, 1]} : vector<8x512xf32> to vector<8x384xf32>
    %72 = arith.negf %71 : vector<8x384xf32>
    %73 = math.exp %72 : vector<8x384xf32>
    %cst_31 = arith.constant 1.000000e+00 : f32
    %74 = vector.broadcast %cst_31 : f32 to vector<8x384xf32>
    %75 = arith.addf %74, %73 : vector<8x384xf32>
    %76 = arith.divf %74, %75 : vector<8x384xf32>
    %77 = vector.extract_strided_slice %70 {offsets = [0, 384], sizes = [8, 128], strides = [1, 1]} : vector<8x512xf32> to vector<8x128xf32>
    %78 = math.tanh %77 : vector<8x128xf32>
    %79 = vector.extract_strided_slice %76 {offsets = [0, 128], sizes = [8, 128], strides = [1, 1]} : vector<8x384xf32> to vector<8x128xf32>
    %80 = arith.mulf %79, %59 : vector<8x128xf32>
    %81 = vector.extract_strided_slice %76 {offsets = [0, 0], sizes = [8, 128], strides = [1, 1]} : vector<8x384xf32> to vector<8x128xf32>
    %82 = arith.mulf %81, %78 : vector<8x128xf32>
    %83 = arith.addf %80, %82 : vector<8x128xf32>
    %84 = vector.extract_strided_slice %76 {offsets = [0, 256], sizes = [8, 128], strides = [1, 1]} : vector<8x384xf32> to vector<8x128xf32>
    %85 = math.tanh %83 : vector<8x128xf32>
    %86 = arith.mulf %84, %85 : vector<8x128xf32>
    %87 = arith.index_cast %66 : i32 to index
    %c0_32 = arith.constant 0 : index
    %88 = vector.load %arg8[%87, %c0_32] : memref<32x128xf32, #tpu.memory_space<vmem>>, vector<8x128xf32>
    tpu.vector_store %arg8[%87, %c0_32], %86 {strides = array<i32>} : memref<32x128xf32, #tpu.memory_space<vmem>>, vector<8x128xf32>,
    %c3_i32 = arith.constant 3 : i32
    %c8_i32_33 = arith.constant 8 : i32
    %89 = arith.muli %c3_i32, %c8_i32_33 : i32
    %90 = tpu.assume_multiple %89, 8 : i32
    %91 = arith.index_cast %90 : i32 to index
    %c0_34 = arith.constant 0 : index
    %92 = vector.load %arg9[%91, %c0_34] : memref<32x512xf32, #tpu.memory_space<vmem>>, vector<8x512xf32>
    %cst_35 = arith.constant dense<0.000000e+00> : vector<8x512xf32>
    %93 = tpu.matmul %86, %12, %cst_35 {dimension_numbers = #tpu.dot_dimension_numbers<[1], [0], [0], [1], [0, 0, 1, 1], [], []>} : vector<8x128xf32>, vector<128x512xf32>, vector<8x512xf32> -> vector<8x512xf32>
    %94 = arith.addf %92, %93 : vector<8x512xf32>
    %95 = vector.extract_strided_slice %94 {offsets = [0, 0], sizes = [8, 384], strides = [1, 1]} : vector<8x512xf32> to vector<8x384xf32>
    %96 = arith.negf %95 : vector<8x384xf32>
    %97 = math.exp %96 : vector<8x384xf32>
    %cst_36 = arith.constant 1.000000e+00 : f32
    %98 = vector.broadcast %cst_36 : f32 to vector<8x384xf32>
    %99 = arith.addf %98, %97 : vector<8x384xf32>
    %100 = arith.divf %98, %99 : vector<8x384xf32>
    %101 = vector.extract_strided_slice %94 {offsets = [0, 384], sizes = [8, 128], strides = [1, 1]} : vector<8x512xf32> to vector<8x128xf32>
    %102 = math.tanh %101 : vector<8x128xf32>
    %103 = vector.extract_strided_slice %100 {offsets = [0, 128], sizes = [8, 128], strides = [1, 1]} : vector<8x384xf32> to vector<8x128xf32>
    %104 = arith.mulf %103, %83 : vector<8x128xf32>
    %105 = vector.extract_strided_slice %100 {offsets = [0, 0], sizes = [8, 128], strides = [1, 1]} : vector<8x384xf32> to vector<8x128xf32>
    %106 = arith.mulf %105, %102 : vector<8x128xf32>
    %107 = arith.addf %104, %106 : vector<8x128xf32>
    %108 = vector.extract_strided_slice %100 {offsets = [0, 256], sizes = [8, 128], strides = [1, 1]} : vector<8x384xf32> to vector<8x128xf32>
    %109 = math.tanh %107 : vector<8x128xf32>
    %110 = arith.mulf %108, %109 : vector<8x128xf32>
    %111 = arith.index_cast %90 : i32 to index
    %c0_37 = arith.constant 0 : index
    %112 = vector.load %arg8[%111, %c0_37] : memref<32x128xf32, #tpu.memory_space<vmem>>, vector<8x128xf32>
    tpu.vector_store %arg8[%111, %c0_37], %110 {strides = array<i32>} : memref<32x128xf32, #tpu.memory_space<vmem>>, vector<8x128xf32>,
    %c4_i32 = arith.constant 4 : i32
    %c0_38 = arith.constant 0 : index
    %c0_39 = arith.constant 0 : index
    %c0_40 = arith.constant 0 : index
    %113 = vector.load %arg10[%c0_38, %c0_39, %c0_40] : memref<2x8x128xf32, #tpu.memory_space<vmem>>, vector<1x8x128xf32>
    %114 = vector.shape_cast %113 : vector<1x8x128xf32> to vector<8x128xf32>
    %115 = vector.shape_cast %110 : vector<8x128xf32> to vector<1x8x128xf32>
    tpu.vector_store %arg10[%c0_38, %c0_39, %c0_40], %115 {strides = array<i32>} : memref<2x8x128xf32, #tpu.memory_space<vmem>>, vector<1x8x128xf32>,
    %c0_41 = arith.constant 0 : index
    %c0_42 = arith.constant 0 : index
    %c0_43 = arith.constant 0 : index
    %116 = vector.load %arg11[%c0_41, %c0_42, %c0_43] : memref<2x8x128xf32, #tpu.memory_space<vmem>>, vector<1x8x128xf32>
    %117 = vector.shape_cast %116 : vector<1x8x128xf32> to vector<8x128xf32>
    %118 = vector.shape_cast %107 : vector<8x128xf32> to vector<1x8x128xf32>
    tpu.vector_store %arg11[%c0_41, %c0_42, %c0_43], %118 {strides = array<i32>} : memref<2x8x128xf32, #tpu.memory_space<vmem>>, vector<1x8x128xf32>,
    %c0_44 = arith.constant 0 : index
    %c0_45 = arith.constant 0 : index
    %119 = vector.load %arg8[%c0_44, %c0_45] : memref<32x128xf32, #tpu.memory_space<vmem>>, vector<32x128xf32>
    %c0_46 = arith.constant 0 : index
    %c0_47 = arith.constant 0 : index
    %c0_48 = arith.constant 0 : index
    %120 = vector.load %arg3[%c0_46, %c0_47, %c0_48] : memref<1x128x512xf32, #tpu.memory_space<vmem>>, vector<1x128x512xf32>
    %121 = vector.shape_cast %120 : vector<1x128x512xf32> to vector<128x512xf32>
    %cst_49 = arith.constant dense<0.000000e+00> : vector<32x512xf32>
    %122 = tpu.matmul %119, %121, %cst_49 {dimension_numbers = #tpu.dot_dimension_numbers<[1], [0], [0], [1], [0, 0, 1, 1], [], []>} : vector<32x128xf32>, vector<128x512xf32>, vector<32x512xf32> -> vector<32x512xf32>
    %c1 = arith.constant 1 : index
    %c0_50 = arith.constant 0 : index
    %c0_51 = arith.constant 0 : index
    %123 = vector.load %arg5[%c1, %c0_50, %c0_51] : memref<2x1x512xf32, #tpu.memory_space<vmem>>, vector<1x1x512xf32>
    %124 = vector.shape_cast %123 : vector<1x1x512xf32> to vector<1x512xf32>
    %125 = vector.broadcast %124 : vector<1x512xf32> to vector<32x512xf32>
    %126 = arith.addf %122, %125 : vector<32x512xf32>
    %c0_52 = arith.constant 0 : index
    %c0_53 = arith.constant 0 : index
    %127 = vector.load %arg9[%c0_52, %c0_53] : memref<32x512xf32, #tpu.memory_space<vmem>>, vector<32x512xf32>
    tpu.vector_store %arg9[%c0_52, %c0_53], %126 {strides = array<i32>} : memref<32x512xf32, #tpu.memory_space<vmem>>, vector<32x512xf32>,
    %c1_54 = arith.constant 1 : index
    %c0_55 = arith.constant 0 : index
    %c0_56 = arith.constant 0 : index
    %128 = vector.load %arg4[%c1_54, %c0_55, %c0_56] : memref<2x128x512xf32, #tpu.memory_space<vmem>>, vector<1x128x512xf32>
    %129 = vector.shape_cast %128 : vector<1x128x512xf32> to vector<128x512xf32>
    %c1_57 = arith.constant 1 : index
    %c0_58 = arith.constant 0 : index
    %c0_59 = arith.constant 0 : index
    %130 = vector.load %arg10[%c1_57, %c0_58, %c0_59] : memref<2x8x128xf32, #tpu.memory_space<vmem>>, vector<1x8x128xf32>
    %131 = vector.shape_cast %130 : vector<1x8x128xf32> to vector<8x128xf32>
    %c1_60 = arith.constant 1 : index
    %c0_61 = arith.constant 0 : index
    %c0_62 = arith.constant 0 : index
    %132 = vector.load %arg11[%c1_60, %c0_61, %c0_62] : memref<2x8x128xf32, #tpu.memory_space<vmem>>, vector<1x8x128xf32>
    %133 = vector.shape_cast %132 : vector<1x8x128xf32> to vector<8x128xf32>
    %c0_i32_63 = arith.constant 0 : i32
    %c8_i32_64 = arith.constant 8 : i32
    %134 = arith.muli %c0_i32_63, %c8_i32_64 : i32
    %135 = tpu.assume_multiple %134, 8 : i32
    %136 = arith.index_cast %135 : i32 to index
    %c0_65 = arith.constant 0 : index
    %137 = vector.load %arg9[%136, %c0_65] : memref<32x512xf32, #tpu.memory_space<vmem>>, vector<8x512xf32>
    %cst_66 = arith.constant dense<0.000000e+00> : vector<8x512xf32>
    %138 = tpu.matmul %131, %129, %cst_66 {dimension_numbers = #tpu.dot_dimension_numbers<[1], [0], [0], [1], [0, 0, 1, 1], [], []>} : vector<8x128xf32>, vector<128x512xf32>, vector<8x512xf32> -> vector<8x512xf32>
    %139 = arith.addf %137, %138 : vector<8x512xf32>
    %140 = vector.extract_strided_slice %139 {offsets = [0, 0], sizes = [8, 384], strides = [1, 1]} : vector<8x512xf32> to vector<8x384xf32>
    %141 = arith.negf %140 : vector<8x384xf32>
    %142 = math.exp %141 : vector<8x384xf32>
    %cst_67 = arith.constant 1.000000e+00 : f32
    %143 = vector.broadcast %cst_67 : f32 to vector<8x384xf32>
    %144 = arith.addf %143, %142 : vector<8x384xf32>
    %145 = arith.divf %143, %144 : vector<8x384xf32>
    %146 = vector.extract_strided_slice %139 {offsets = [0, 384], sizes = [8, 128], strides = [1, 1]} : vector<8x512xf32> to vector<8x128xf32>
    %147 = math.tanh %146 : vector<8x128xf32>
    %148 = vector.extract_strided_slice %145 {offsets = [0, 128], sizes = [8, 128], strides = [1, 1]} : vector<8x384xf32> to vector<8x128xf32>
    %149 = arith.mulf %148, %133 : vector<8x128xf32>
    %150 = vector.extract_strided_slice %145 {offsets = [0, 0], sizes = [8, 128], strides = [1, 1]} : vector<8x384xf32> to vector<8x128xf32>
    %151 = arith.mulf %150, %147 : vector<8x128xf32>
    %152 = arith.addf %149, %151 : vector<8x128xf32>
    %153 = vector.extract_strided_slice %145 {offsets = [0, 256], sizes = [8, 128], strides = [1, 1]} : vector<8x384xf32> to vector<8x128xf32>
    %154 = math.tanh %152 : vector<8x128xf32>
    %155 = arith.mulf %153, %154 : vector<8x128xf32>
    %c1_i32_68 = arith.constant 1 : i32
    %c8_i32_69 = arith.constant 8 : i32
    %156 = arith.muli %c1_i32_68, %c8_i32_69 : i32
    %157 = tpu.assume_multiple %156, 8 : i32
    %158 = arith.index_cast %157 : i32 to index
    %c0_70 = arith.constant 0 : index
    %159 = vector.load %arg9[%158, %c0_70] : memref<32x512xf32, #tpu.memory_space<vmem>>, vector<8x512xf32>
    %cst_71 = arith.constant dense<0.000000e+00> : vector<8x512xf32>
    %160 = tpu.matmul %155, %129, %cst_71 {dimension_numbers = #tpu.dot_dimension_numbers<[1], [0], [0], [1], [0, 0, 1, 1], [], []>} : vector<8x128xf32>, vector<128x512xf32>, vector<8x512xf32> -> vector<8x512xf32>
    %161 = arith.addf %159, %160 : vector<8x512xf32>
    %162 = vector.extract_strided_slice %161 {offsets = [0, 0], sizes = [8, 384], strides = [1, 1]} : vector<8x512xf32> to vector<8x384xf32>
    %163 = arith.negf %162 : vector<8x384xf32>
    %164 = math.exp %163 : vector<8x384xf32>
    %cst_72 = arith.constant 1.000000e+00 : f32
    %165 = vector.broadcast %cst_72 : f32 to vector<8x384xf32>
    %166 = arith.addf %165, %164 : vector<8x384xf32>
    %167 = arith.divf %165, %166 : vector<8x384xf32>
    %168 = vector.extract_strided_slice %161 {offsets = [0, 384], sizes = [8, 128], strides = [1, 1]} : vector<8x512xf32> to vector<8x128xf32>
    %169 = math.tanh %168 : vector<8x128xf32>
    %170 = vector.extract_strided_slice %167 {offsets = [0, 128], sizes = [8, 128], strides = [1, 1]} : vector<8x384xf32> to vector<8x128xf32>
    %171 = arith.mulf %170, %152 : vector<8x128xf32>
    %172 = vector.extract_strided_slice %167 {offsets = [0, 0], sizes = [8, 128], strides = [1, 1]} : vector<8x384xf32> to vector<8x128xf32>
    %173 = arith.mulf %172, %169 : vector<8x128xf32>
    %174 = arith.addf %171, %173 : vector<8x128xf32>
    %175 = vector.extract_strided_slice %167 {offsets = [0, 256], sizes = [8, 128], strides = [1, 1]} : vector<8x384xf32> to vector<8x128xf32>
    %176 = math.tanh %174 : vector<8x128xf32>
    %177 = arith.mulf %175, %176 : vector<8x128xf32>
    %c2_i32_73 = arith.constant 2 : i32
    %c8_i32_74 = arith.constant 8 : i32
    %178 = arith.muli %c2_i32_73, %c8_i32_74 : i32
    %179 = tpu.assume_multiple %178, 8 : i32
    %180 = arith.index_cast %179 : i32 to index
    %c0_75 = arith.constant 0 : index
    %181 = vector.load %arg9[%180, %c0_75] : memref<32x512xf32, #tpu.memory_space<vmem>>, vector<8x512xf32>
    %cst_76 = arith.constant dense<0.000000e+00> : vector<8x512xf32>
    %182 = tpu.matmul %177, %129, %cst_76 {dimension_numbers = #tpu.dot_dimension_numbers<[1], [0], [0], [1], [0, 0, 1, 1], [], []>} : vector<8x128xf32>, vector<128x512xf32>, vector<8x512xf32> -> vector<8x512xf32>
    %183 = arith.addf %181, %182 : vector<8x512xf32>
    %184 = vector.extract_strided_slice %183 {offsets = [0, 0], sizes = [8, 384], strides = [1, 1]} : vector<8x512xf32> to vector<8x384xf32>
    %185 = arith.negf %184 : vector<8x384xf32>
    %186 = math.exp %185 : vector<8x384xf32>
    %cst_77 = arith.constant 1.000000e+00 : f32
    %187 = vector.broadcast %cst_77 : f32 to vector<8x384xf32>
    %188 = arith.addf %187, %186 : vector<8x384xf32>
    %189 = arith.divf %187, %188 : vector<8x384xf32>
    %190 = vector.extract_strided_slice %183 {offsets = [0, 384], sizes = [8, 128], strides = [1, 1]} : vector<8x512xf32> to vector<8x128xf32>
    %191 = math.tanh %190 : vector<8x128xf32>
    %192 = vector.extract_strided_slice %189 {offsets = [0, 128], sizes = [8, 128], strides = [1, 1]} : vector<8x384xf32> to vector<8x128xf32>
    %193 = arith.mulf %192, %174 : vector<8x128xf32>
    %194 = vector.extract_strided_slice %189 {offsets = [0, 0], sizes = [8, 128], strides = [1, 1]} : vector<8x384xf32> to vector<8x128xf32>
    %195 = arith.mulf %194, %191 : vector<8x128xf32>
    %196 = arith.addf %193, %195 : vector<8x128xf32>
    %197 = vector.extract_strided_slice %189 {offsets = [0, 256], sizes = [8, 128], strides = [1, 1]} : vector<8x384xf32> to vector<8x128xf32>
    %198 = math.tanh %196 : vector<8x128xf32>
    %199 = arith.mulf %197, %198 : vector<8x128xf32>
    %c3_i32_78 = arith.constant 3 : i32
    %c8_i32_79 = arith.constant 8 : i32
    %200 = arith.muli %c3_i32_78, %c8_i32_79 : i32
    %201 = tpu.assume_multiple %200, 8 : i32
    %202 = arith.index_cast %201 : i32 to index
    %c0_80 = arith.constant 0 : index
    %203 = vector.load %arg9[%202, %c0_80] : memref<32x512xf32, #tpu.memory_space<vmem>>, vector<8x512xf32>
    %cst_81 = arith.constant dense<0.000000e+00> : vector<8x512xf32>
    %204 = tpu.matmul %199, %129, %cst_81 {dimension_numbers = #tpu.dot_dimension_numbers<[1], [0], [0], [1], [0, 0, 1, 1], [], []>} : vector<8x128xf32>, vector<128x512xf32>, vector<8x512xf32> -> vector<8x512xf32>
    %205 = arith.addf %203, %204 : vector<8x512xf32>
    %206 = vector.extract_strided_slice %205 {offsets = [0, 0], sizes = [8, 384], strides = [1, 1]} : vector<8x512xf32> to vector<8x384xf32>
    %207 = arith.negf %206 : vector<8x384xf32>
    %208 = math.exp %207 : vector<8x384xf32>
    %cst_82 = arith.constant 1.000000e+00 : f32
    %209 = vector.broadcast %cst_82 : f32 to vector<8x384xf32>
    %210 = arith.addf %209, %208 : vector<8x384xf32>
    %211 = arith.divf %209, %210 : vector<8x384xf32>
    %212 = vector.extract_strided_slice %205 {offsets = [0, 384], sizes = [8, 128], strides = [1, 1]} : vector<8x512xf32> to vector<8x128xf32>
    %213 = math.tanh %212 : vector<8x128xf32>
    %214 = vector.extract_strided_slice %211 {offsets = [0, 128], sizes = [8, 128], strides = [1, 1]} : vector<8x384xf32> to vector<8x128xf32>
    %215 = arith.mulf %214, %196 : vector<8x128xf32>
    %216 = vector.extract_strided_slice %211 {offsets = [0, 0], sizes = [8, 128], strides = [1, 1]} : vector<8x384xf32> to vector<8x128xf32>
    %217 = arith.mulf %216, %213 : vector<8x128xf32>
    %218 = arith.addf %215, %217 : vector<8x128xf32>
    %219 = vector.extract_strided_slice %211 {offsets = [0, 256], sizes = [8, 128], strides = [1, 1]} : vector<8x384xf32> to vector<8x128xf32>
    %220 = math.tanh %218 : vector<8x128xf32>
    %221 = arith.mulf %219, %220 : vector<8x128xf32>
    %c4_i32_83 = arith.constant 4 : i32
    %c1_84 = arith.constant 1 : index
    %c0_85 = arith.constant 0 : index
    %c0_86 = arith.constant 0 : index
    %222 = vector.load %arg10[%c1_84, %c0_85, %c0_86] : memref<2x8x128xf32, #tpu.memory_space<vmem>>, vector<1x8x128xf32>
    %223 = vector.shape_cast %222 : vector<1x8x128xf32> to vector<8x128xf32>
    %224 = vector.shape_cast %221 : vector<8x128xf32> to vector<1x8x128xf32>
    tpu.vector_store %arg10[%c1_84, %c0_85, %c0_86], %224 {strides = array<i32>} : memref<2x8x128xf32, #tpu.memory_space<vmem>>, vector<1x8x128xf32>,
    %c1_87 = arith.constant 1 : index
    %c0_88 = arith.constant 0 : index
    %c0_89 = arith.constant 0 : index
    %225 = vector.load %arg11[%c1_87, %c0_88, %c0_89] : memref<2x8x128xf32, #tpu.memory_space<vmem>>, vector<1x8x128xf32>
    %226 = vector.shape_cast %225 : vector<1x8x128xf32> to vector<8x128xf32>
    %227 = vector.shape_cast %218 : vector<8x128xf32> to vector<1x8x128xf32>
    tpu.vector_store %arg11[%c1_87, %c0_88, %c0_89], %227 {strides = array<i32>} : memref<2x8x128xf32, #tpu.memory_space<vmem>>, vector<1x8x128xf32>,
    %c1_i32_90 = arith.constant 1 : i32
    %228 = arith.cmpi eq, %arg0, %c1_i32_90 : i32
    %229 = arith.extui %228 : i1 to i32
    %c0_i32_91 = arith.constant 0 : i32
    %230 = arith.cmpi ne, %229, %c0_i32_91 : i32
    scf.if %230 {
      %c0_92 = arith.constant 0 : index
      %c0_93 = arith.constant 0 : index
      %c0_94 = arith.constant 0 : index
      %231 = vector.load %arg10[%c0_92, %c0_93, %c0_94] : memref<2x8x128xf32, #tpu.memory_space<vmem>>, vector<2x8x128xf32>
      %c0_95 = arith.constant 0 : index
      %c0_96 = arith.constant 0 : index
      %c0_97 = arith.constant 0 : index
      %232 = vector.load %arg6[%c0_95, %c0_96, %c0_97] : memref<2x8x128xf32, #tpu.memory_space<vmem>>, vector<2x8x128xf32>
      tpu.vector_store %arg6[%c0_95, %c0_96, %c0_97], %231 {strides = array<i32>} : memref<2x8x128xf32, #tpu.memory_space<vmem>>, vector<2x8x128xf32>,
      %c0_98 = arith.constant 0 : index
      %c0_99 = arith.constant 0 : index
      %c0_100 = arith.constant 0 : index
      %233 = vector.load %arg11[%c0_98, %c0_99, %c0_100] : memref<2x8x128xf32, #tpu.memory_space<vmem>>, vector<2x8x128xf32>
      %c0_101 = arith.constant 0 : index
      %c0_102 = arith.constant 0 : index
      %c0_103 = arith.constant 0 : index
      %234 = vector.load %arg7[%c0_101, %c0_102, %c0_103] : memref<2x8x128xf32, #tpu.memory_space<vmem>>, vector<2x8x128xf32>
      tpu.vector_store %arg7[%c0_101, %c0_102, %c0_103], %233 {strides = array<i32>} : memref<2x8x128xf32, #tpu.memory_space<vmem>>, vector<2x8x128xf32>,
    } else {
    }
    return
  }
  func.func @transform_0(%arg0: i32) -> (i32, i32) {
    %c0_i32 = arith.constant 0 : i32
    %c0_i32_0 = arith.constant 0 : i32
    return %arg0, %c0_i32 : i32, i32
  }
  func.func @transform_1(%arg0: i32) -> (i32, i32) {
    %c0_i32 = arith.constant 0 : i32
    %c0_i32_0 = arith.constant 0 : i32
    %c0_i32_1 = arith.constant 0 : i32
    return %c0_i32, %c0_i32_0 : i32, i32
  }
  func.func @transform_2(%arg0: i32) -> (i32, i32, i32) {
    %c0_i32 = arith.constant 0 : i32
    %c0_i32_0 = arith.constant 0 : i32
    %c0_i32_1 = arith.constant 0 : i32
    %c0_i32_2 = arith.constant 0 : i32
    return %c0_i32, %c0_i32_0, %c0_i32_1 : i32, i32, i32
  }
  func.func @transform_3(%arg0: i32) -> (i32, i32, i32) {
    %c0_i32 = arith.constant 0 : i32
    %c0_i32_0 = arith.constant 0 : i32
    %c0_i32_1 = arith.constant 0 : i32
    %c0_i32_2 = arith.constant 0 : i32
    return %c0_i32, %c0_i32_0, %c0_i32_1 : i32, i32, i32
  }
  func.func @transform_4(%arg0: i32) -> (i32, i32, i32) {
    %c0_i32 = arith.constant 0 : i32
    %c0_i32_0 = arith.constant 0 : i32
    %c0_i32_1 = arith.constant 0 : i32
    %c0_i32_2 = arith.constant 0 : i32
    return %c0_i32, %c0_i32_0, %c0_i32_1 : i32, i32, i32
  }
  func.func @transform_5(%arg0: i32) -> (i32, i32, i32) {
    %c0_i32 = arith.constant 0 : i32
    %c0_i32_0 = arith.constant 0 : i32
    %c0_i32_1 = arith.constant 0 : i32
    %c0_i32_2 = arith.constant 0 : i32
    return %c0_i32, %c0_i32_0, %c0_i32_1 : i32, i32, i32
  }
  func.func @transform_6(%arg0: i32) -> (i32, i32, i32) {
    %c0_i32 = arith.constant 0 : i32
    %c0_i32_0 = arith.constant 0 : i32
    %c0_i32_1 = arith.constant 0 : i32
    %c0_i32_2 = arith.constant 0 : i32
    return %c0_i32, %c0_i32_0, %c0_i32_1 : i32, i32, i32
  }
}

</mosaic_0001>

<bundles_post_ra>
// kernel: encoder_forward.1
= control target key start
LH: loop header
LB: loop body
LE: loop exit
PB: predicated region body
PF: predicated region fallthrough
CT: control target
= control target key end

     0   :  { %12 = vsyncpa [#allocation7], 0  ;;  %s4472_s0 = inlined_call_operand.vmem [shape: f32[64,128], index: 0, kind: input, shape index: {}]   ;;  %s4473_s1 = inlined_call_operand.vmem [shape: f32[128,512], index: 1, kind: input, shape index: {}]   ;;  %s4474_s2 = inlined_call_operand.hbm [shape: f32[1,128,512], index: 2, kind: input, shape index: {}]   ;;  %s4475_s3 = inlined_call_operand.hbm [shape: f32[2,128,512], index: 3, kind: input, shape index: {}]   ;;  %s4476_s4 = inlined_call_operand.vmem [shape: f32[2,1,512], index: 4, kind: input, shape index: {}]   ;;  %s4477_s5 = inlined_call_operand.hbm [shape: f32[2,8,128], index: 5, kind: output, shape index: {0}]   ;;  %s4478_s6 = inlined_call_operand.hbm [shape: f32[2,8,128], index: 6, kind: output, shape index: {1}]  }
   0x1   :  { %13 = vsyncpa [#allocation10], 0 }
   0x2   :  { %14 = vsyncpa [#allocation8], 0 }
   0x3   :  { %15 = vsyncpa [#allocation13], 0  ;;  %s3606_s21 = smov 0  }
   0x4 LB: > { %s3612_s22 = sadd.s32 4294967295, %s3559_s21   ;;  %p2506_p0 = scmp.ge.s32.totalorder %s3559_s21, 1  ;;  %s3559_s21 = sphi %s3606_s21, %s21_s21  }
   0x5   : > { %p178_p1 = scmp.lt.s32.totalorder %s3559_s21, 3  ;;  %s3561_s23 = smov [#allocation6]  }
   0x6   : > { %s193_s24 = sshll.u32 %s3561_s23, 4  ;;  %p4479_p4 = scmp.eq.s32.totalorder %s3612_s22, 0  ;;  %s194_s24 = int_to_ptr.vmem [resolvable:$true] %s193_s24 }
   0x7   : > { %p3617_p3 = pnand %p2506_p0, %p178_p1  ;;  %s3562_s26 = smov [#allocation9]  }
   0x8   : > { %s206_s27 = sshll.u32 %s3562_s26, 4  ;;  %s3429_s7 = scalar_lea.hbm %s4474_s2, 8192  ;;  %s3630_s27 = int_to_ptr.vmem [resolvable:$true] %s206_s27 }
   0x9   : > { %s4481_s25 = scalar_select %p3617_p3, 1, 0 }
   0xa   : > { %p3268_p5 = pneg %p3617_p3  ;;  %p3430_p7 = scmp.ne.s32.totalorder %s4474_s2, %s3429_s7 }
   0xb   : > { %p3436_p11 = scmp.lt.u32.totalorder %s3429_s7, %s4474_s2 }
   0xc   : > { %p3626_p6 = pnand %p4479_p4, %p3268_p5 }
   0xe   : > { %p3431_p8 = pneg %p3626_p6 }
  0x10   : > { %p3432_p9 = pnand %p3431_p8, %p3430_p7 }
  0x12   : > { %p3433_p10 = pneg %p3432_p9 }
  0x14   : > { %p3438_p12 = pnand %p3436_p11, %p3433_p10 }
  0x16   : > { %3441 = shalt.err (!%p3438_p12)
}
  0x17   : > { %s3442_s12 = scalar_lea.vmem %s194_s24, 8192  ;;  %p3450_p5 = scmp.lt.s32.totalorder %s194_s24, %s194_s24 }
  0x18   : > { %p3443_p13 = scmp.ne.s32.totalorder %s194_s24, %s3442_s12  ;;  %p3451_p2 = scmp.lt.s32.totalorder %s3442_s12, %s3442_s12 }
  0x1a   : > { %p3445_p0 = pnand %p3443_p13, %p3431_p8  ;;  %p3452_p4 = por %p3451_p2, %p3450_p5 }
  0x1c   : > { %p3446_p1 = pneg %p3445_p0 }
  0x1e   : > { %p3453_p3 = pnand %p3452_p4, %p3446_p1 }
  0x20   : > { %3456 = shalt.err (!%p3453_p3)
}
  0x21   : > { %s3563_s13 = smov 512   ;;  %s3564_s14 = smov 32  }
  0x22   : > { %3271 = dma.hbm_to_vmem [thread:$0]  (!%p3626_p6), %s4474_s2, 8192, %s194_s24, [#allocation7], %s3563_s13, %s3563_s13, %s3564_s14  }
  0x23   : > { %s3457_s19 = scalar_lea.hbm %s4475_s3, 16384 }
  0x24   : > { %p3458_p7 = scmp.ne.s32.totalorder %s4475_s3, %s3457_s19  ;;  %p3464_p4 = scmp.lt.u32.totalorder %s3457_s19, %s4475_s3 }
  0x26   : > { %p3460_p2 = pnand %p3458_p7, %p3431_p8 }
  0x28   : > { %p3461_p3 = pneg %p3460_p2 }
  0x2a   : > { %p3466_p9 = pnand %p3464_p4, %p3461_p3 }
  0x2c   : > { %3469 = shalt.err (!%p3466_p9)
}
  0x2d   : > { %s3470_s24 = scalar_lea.vmem %s3630_s27, 16384  ;;  %p3478_p13 = scmp.lt.s32.totalorder %s3630_s27, %s3630_s27 }
  0x2e   : > { %p3471_p10 = scmp.ne.s32.totalorder %s3630_s27, %s3470_s24  ;;  %p3479_p0 = scmp.lt.s32.totalorder %s3470_s24, %s3470_s24 }
  0x30   : > { %p3473_p11 = pnand %p3471_p10, %p3431_p8  ;;  %p3480_p1 = por %p3479_p0, %p3478_p13 }
  0x32   : > { %p3474_p12 = pneg %p3473_p11 }
  0x34   : > { %p3481_p5 = pnand %p3480_p1, %p3474_p12 }
  0x36   : > { %3484 = shalt.err (!%p3481_p5)
}
  0x37   : > { %3274 = dma.hbm_to_vmem [thread:$0]  (!%p3626_p6), %s4475_s3, 16384, %s3630_s27, [#allocation10], %s3563_s13, %s3563_s13, %s3564_s14  }
  0x38   : > { %p4483_p7 = scmp.ne.s32.totalorder %s4481_s25, 0 }
  0x39   : > { %p4484_p2 = scmp.eq.s32.totalorder (!%p4483_p7), %s3612_s22, 0 }
  0x3a   : > { %234 = sbr.rel (%p4483_p7) target bundleno = 2274 (0x8e2), region = 40 }
  0x41   : > { %3542 = dma.done.wait (%p4484_p2), [#allocation7], 8192   ;;  %p4485_p8 = pmov %p4484_p2 }
  0x42   : > { %p4486_p3 = pmov %p4484_p2 }
  0x43   : > { %3544 = vsyncadd (%p4485_p8), [#allocation7], 4294959104 }
  0x44   : > { %3546 = dma.done.wait (%p4486_p3), [#allocation10], 16384   ;;  %p4487_p4 = pmov %p4484_p2 }
  0x45   : > { %s2513_s28 = sshll.u32 %s3612_s22, 2  ;;  %p4488_p6 = scmp.ne.s32.totalorder %s3612_s22, 0 }
  0x46   : > { %3548 = vsyncadd (%p4487_p4), [#allocation10], 4294950912  ;;  %p264_p9 = scmp.lt.s32.totalorder %s2513_s28, 7  ;;  %v3565_v0 = vmov (!%p4488_p6), 0.0  }
  0x47   : > { %272 = sbr.rel (%p4488_p6) target bundleno = 78 (0x4e), region = 52  ;;  %273 = vst [vmem:[#allocation4] sm:$0xff] (!%p4488_p6), %v3565_v0  ;;  %274 = vst [vmem:[#allocation4 + $0x8] sm:$0xff] (!%p4488_p6), %v3565_v0 }
  0x48   : > { %s4490_s28 = smov (!%p264_p9, %s2513_s28), 7  ;;  %275 = vst [vmem:[#allocation5] sm:$0xff] (!%p4488_p6), %v3565_v0  ;;  %276 = vst [vmem:[#allocation5 + $0x8] sm:$0xff] (!%p4488_p6), %v3565_v0 }
  0x49   : > { %s2514_s27 = sshll.u32 %s4490_s28, 3 }
  0x4a   : > { %s3693_s9 = scalar_lea.vmem %s4472_s0, %s2514_s27 }
  0x4e PF: > { %v282_v1 = vld [vmem:[%s4473_s1 + $0x8] sm:$0xff]  ;;  %v284_v3 = vld [vmem:[%s4473_s1 + $0x18] sm:$0xff]  ;;  %v281_v6 = vld [vmem:[%s4473_s1] sm:$0xff]  ;;  %v3566_v8 = vmov 0.0   ;;  %p2541_p10 = scmp.ne.s32.totalorder %s3612_s22, 1 }
  0x4f   : > { %v286_v2 = vld [vmem:[%s4473_s1 + $0x28] sm:$0xff]  ;;  %v288_v5 = vld [vmem:[%s4473_s1 + $0x38] sm:$0xff]  ;;  %v285_v7 = vld [vmem:[%s4473_s1 + $0x20] sm:$0xff]  ;;  %431 = vmatprep.mubr.f32.mxu0 %v3566_v8  ;;  %520 = vmatprep.mubr.f32.mxu1 %v3566_v8 }
  0x50   : > { %v2548_v4 = vpack.c.bf16 %v286_v2, %v282_v1  ;;  %v2580_v9 = vpack.c.bf16 %v288_v5, %v284_v3  ;;  %v2550_v10 = vpack.c.bf16 %v285_v7, %v281_v6  ;;  %v283_v11 = vld [vmem:[%s4473_s1 + $0x10] sm:$0xff]  ;;  %v290_v13 = vld [vmem:[%s4473_s1 + $0x48] sm:$0xff]  ;;  %v292_v16 = vld [vmem:[%s4473_s1 + $0x58] sm:$0xff] }
  0x51   : > { %v287_v12 = vld [vmem:[%s4473_s1 + $0x30] sm:$0xff]  ;;  %v294_v15 = vld [vmem:[%s4473_s1 + $0x68] sm:$0xff]  ;;  %v296_v17 = vld [vmem:[%s4473_s1 + $0x78] sm:$0xff] }
  0x52   : > { %2549 = vmatprep.subr.bf16.mxu0 %v2548_v4  ;;  %v2582_v14 = vpack.c.bf16 %v287_v12, %v283_v11  ;;  %2581 = vmatprep.subr.bf16.mxu1 %v2580_v9  ;;  %v2552_v18 = vpack.c.bf16 %v294_v15, %v290_v13  ;;  %v2584_v19 = vpack.c.bf16 %v296_v17, %v292_v16  ;;  %v289_v20 = vld [vmem:[%s4473_s1 + $0x40] sm:$0xff]  ;;  %v291_v22 = vld [vmem:[%s4473_s1 + $0x50] sm:$0xff]  ;;  %v298_v25 = vld [vmem:[%s4473_s1 + $0x88] sm:$0xff] }
  0x53   : > { %2551 = vmatpush1.bf16.msra.mxu0 %v2550_v10  ;;  %v293_v21 = vld [vmem:[%s4473_s1 + $0x60] sm:$0xff]  ;;  %v295_v24 = vld [vmem:[%s4473_s1 + $0x70] sm:$0xff]  ;;  %v302_v26 = vld [vmem:[%s4473_s1 + $0xa8] sm:$0xff] }
  0x54   : > { %2583 = vmatpush1.bf16.msra.mxu1 %v2582_v14  ;;  %v2554_v23 = vpack.c.bf16 %v293_v21, %v289_v20  ;;  %2553 = vmatprep.subr.bf16.mxu0 %v2552_v18  ;;  %v2586_v27 = vpack.c.bf16 %v295_v24, %v291_v22  ;;  %v2556_v28 = vpack.c.bf16 %v302_v26, %v298_v25  ;;  %v300_v29 = vld [vmem:[%s4473_s1 + $0x98] sm:$0xff]  ;;  %v297_v31 = vld [vmem:[%s4473_s1 + $0x80] sm:$0xff]  ;;  %v299_v34 = vld [vmem:[%s4473_s1 + $0x90] sm:$0xff] }
  0x55   : > { %2585 = vmatprep.subr.bf16.mxu1 %v2584_v19  ;;  %v304_v30 = vld [vmem:[%s4473_s1 + $0xb8] sm:$0xff]  ;;  %v301_v33 = vld [vmem:[%s4473_s1 + $0xa0] sm:$0xff]  ;;  %v303_v35 = vld [vmem:[%s4473_s1 + $0xb0] sm:$0xff] }
  0x56   : > { %v2588_v32 = vpack.c.bf16 %v304_v30, %v300_v29  ;;  %v2558_v36 = vpack.c.bf16 %v301_v33, %v297_v31  ;;  %v306_v37 = vld [vmem:[%s4473_s1 + $0xc8] sm:$0xff]  ;;  %v308_v39 = vld [vmem:[%s4473_s1 + $0xd8] sm:$0xff]  ;;  %v2590_v40 = vpack.c.bf16 %v303_v35, %v299_v34  ;;  %v305_v43 = vld [vmem:[%s4473_s1 + $0xc0] sm:$0xff] }
  0x57   : > { %2555 = vmatpush1.bf16.msra.mxu0 %v2554_v23  ;;  %v310_v38 = vld [vmem:[%s4473_s1 + $0xe8] sm:$0xff]  ;;  %v312_v42 = vld [vmem:[%s4473_s1 + $0xf8] sm:$0xff]  ;;  %v309_v44 = vld [vmem:[%s4473_s1 + $0xe0] sm:$0xff] }
  0x58   : > { %2587 = vmatpush1.bf16.msra.mxu1 %v2586_v27  ;;  %2557 = vmatprep.subr.bf16.mxu0 %v2556_v28  ;;  %v2560_v41 = vpack.c.bf16 %v310_v38, %v306_v37  ;;  %v2592_v45 = vpack.c.bf16 %v312_v42, %v308_v39  ;;  %v307_v46 = vld [vmem:[%s4473_s1 + $0xd0] sm:$0xff]  ;;  %v314_v48 = vld [vmem:[%s4473_s1 + $0x108] sm:$0xff]  ;;  %v316_v50 = vld [vmem:[%s4473_s1 + $0x118] sm:$0xff]  ;;  %v2562_v52 = vpack.c.bf16 %v309_v44, %v305_v43 }
  0x59   : > { %2589 = vmatprep.subr.bf16.mxu1 %v2588_v32  ;;  %v311_v47 = vld [vmem:[%s4473_s1 + $0xf0] sm:$0xff]  ;;  %v318_v49 = vld [vmem:[%s4473_s1 + $0x128] sm:$0xff]  ;;  %v320_v51 = vld [vmem:[%s4473_s1 + $0x138] sm:$0xff] }
  0x5a   : > { %v2594_v53 = vpack.c.bf16 %v311_v47, %v307_v46  ;;  %v2564_v54 = vpack.c.bf16 %v318_v49, %v314_v48  ;;  %v313_v55 = vld [vmem:[%s4473_s1 + $0x100] sm:$0xff]  ;;  %v315_v57 = vld [vmem:[%s4473_s1 + $0x110] sm:$0xff]  ;;  %v2596_v58 = vpack.c.bf16 %v320_v51, %v316_v50  ;;  %v322_v60 = vld [vmem:[%s4473_s1 + $0x148] sm:$0xff] }
  0x5b   : > { %2559 = vmatpush1.bf16.msra.mxu0 %v2558_v36  ;;  %v317_v56 = vld [vmem:[%s4473_s1 + $0x120] sm:$0xff]  ;;  %v319_v59 = vld [vmem:[%s4473_s1 + $0x130] sm:$0xff]  ;;  %v326_v61 = vld [vmem:[%s4473_s1 + $0x168] sm:$0xff] }
  0x5c   : > { %2591 = vmatpush1.bf16.msra.mxu1 %v2590_v40  ;;  %2561 = vmatprep.subr.bf16.mxu0 %v2560_v41  ;;  %v324_v62 = vld [vmem:[%s4473_s1 + $0x158] sm:$0xff]  ;;  %v2566_v0 = vpack.c.bf16 %v317_v56, %v313_v55  ;;  %v2598_v1 = vpack.c.bf16 %v319_v59, %v315_v57  ;;  %v2568_v2 = vpack.c.bf16 %v326_v61, %v322_v60  ;;  %v321_v3 = vld [vmem:[%s4473_s1 + $0x140] sm:$0xff]  ;;  %v323_v5 = vld [vmem:[%s4473_s1 + $0x150] sm:$0xff] }
  0x5d   : > { %2593 = vmatprep.subr.bf16.mxu1 %v2592_v45  ;;  %v328_v63 = vld [vmem:[%s4473_s1 + $0x178] sm:$0xff]  ;;  %v325_v4 = vld [vmem:[%s4473_s1 + $0x160] sm:$0xff]  ;;  %v327_v7 = vld [vmem:[%s4473_s1 + $0x170] sm:$0xff] }
  0x5e   : > { %v2600_v6 = vpack.c.bf16 %v328_v63, %v324_v62  ;;  %v330_v9 = vld [vmem:[%s4473_s1 + $0x188] sm:$0xff]  ;;  %v332_v11 = vld [vmem:[%s4473_s1 + $0x198] sm:$0xff]  ;;  %v2570_v13 = vpack.c.bf16 %v325_v4, %v321_v3  ;;  %v2602_v14 = vpack.c.bf16 %v327_v7, %v323_v5  ;;  %v329_v16 = vld [vmem:[%s4473_s1 + $0x180] sm:$0xff] }
  0x5f   : > { %2563 = vmatpush1.bf16.msra.mxu0 %v2562_v52  ;;  %v334_v10 = vld [vmem:[%s4473_s1 + $0x1a8] sm:$0xff]  ;;  %v336_v12 = vld [vmem:[%s4473_s1 + $0x1b8] sm:$0xff]  ;;  %v333_v17 = vld [vmem:[%s4473_s1 + $0x1a0] sm:$0xff] }
  0x60   : > { %2595 = vmatpush1.bf16.msra.mxu1 %v2594_v53  ;;  %2565 = vmatprep.subr.bf16.mxu0 %v2564_v54  ;;  %v2572_v15 = vpack.c.bf16 %v334_v10, %v330_v9  ;;  %v331_v18 = vld [vmem:[%s4473_s1 + $0x190] sm:$0xff]  ;;  %v2604_v19 = vpack.c.bf16 %v336_v12, %v332_v11  ;;  %v338_v21 = vld [vmem:[%s4473_s1 + $0x1c8] sm:$0xff]  ;;  %v340_v23 = vld [vmem:[%s4473_s1 + $0x1d8] sm:$0xff]  ;;  %v2574_v25 = vpack.c.bf16 %v333_v17, %v329_v16 }
  0x61   : > { %2597 = vmatprep.subr.bf16.mxu1 %v2596_v58  ;;  %v335_v20 = vld [vmem:[%s4473_s1 + $0x1b0] sm:$0xff]  ;;  %v342_v22 = vld [vmem:[%s4473_s1 + $0x1e8] sm:$0xff]  ;;  %v344_v24 = vld [vmem:[%s4473_s1 + $0x1f8] sm:$0xff] }
  0x62   : > { %v2606_v26 = vpack.c.bf16 %v335_v20, %v331_v18  ;;  %v2576_v27 = vpack.c.bf16 %v342_v22, %v338_v21  ;;  %v337_v28 = vld [vmem:[%s4473_s1 + $0x1c0] sm:$0xff]  ;;  %v339_v30 = vld [vmem:[%s4473_s1 + $0x1d0] sm:$0xff]  ;;  %v2608_v31 = vpack.c.bf16 %v344_v24, %v340_v23  ;;  %v562_v33 = vld [vmem:[#allocation9 + $0x8] sm:$0xff] }
  0x63   : > { %2567 = vmatpush1.bf16.msra.mxu0 %v2566_v0  ;;  %v341_v29 = vld [vmem:[%s4473_s1 + $0x1e0] sm:$0xff]  ;;  %v343_v32 = vld [vmem:[%s4473_s1 + $0x1f0] sm:$0xff]  ;;  %v566_v34 = vld [vmem:[#allocation9 + $0x28] sm:$0xff] }
  0x64   : > { %2599 = vmatpush1.bf16.msra.mxu1 %v2598_v1  ;;  %2569 = vmatprep.subr.bf16.mxu0 %v2568_v2  ;;  %v564_v35 = vld [vmem:[#allocation9 + $0x18] sm:$0xff]  ;;  %v2578_v37 = vpack.c.bf16 %v341_v29, %v337_v28  ;;  %v2610_v38 = vpack.c.bf16 %v343_v32, %v339_v30  ;;  %v3891_v39 = vpack.c.bf16 %v566_v34, %v562_v33  ;;  %v561_v40 = vld [vmem:[#allocation9] sm:$0xff]  ;;  %v563_v42 = vld [vmem:[#allocation9 + $0x10] sm:$0xff] }
  0x65   : > { %2601 = vmatprep.subr.bf16.mxu1 %v2600_v6  ;;  %v568_v36 = vld [vmem:[#allocation9 + $0x38] sm:$0xff]  ;;  %v565_v41 = vld [vmem:[#allocation9 + $0x20] sm:$0xff]  ;;  %v567_v44 = vld [vmem:[#allocation9 + $0x30] sm:$0xff] }
  0x66   : > { %v3893_v43 = vpack.c.bf16 %v568_v36, %v564_v35  ;;  %v570_v45 = vld [vmem:[#allocation9 + $0x48] sm:$0xff]  ;;  %v572_v47 = vld [vmem:[#allocation9 + $0x58] sm:$0xff]  ;;  %v277_v49 = vld [vmem:[%s3693_s9] sm:$0xff]  ;;  %v3896_v50 = vpack.c.bf16 %v565_v41, %v561_v40  ;;  %v3899_v51 = vpack.c.bf16 %v567_v44, %v563_v42 }
  0x67   : > { %2571 = vmatpush1.bf16.msra.mxu0 %v2570_v13  ;;  %v574_v46 = vld [vmem:[#allocation9 + $0x68] sm:$0xff]  ;;  %v576_v48 = vld [vmem:[#allocation9 + $0x78] sm:$0xff]  ;;  %v569_v53 = vld [vmem:[#allocation9 + $0x40] sm:$0xff] }
  0x68   : > { %2603 = vmatpush1.bf16.msra.mxu1 %v2602_v14  ;;  %2573 = vmatprep.subr.bf16.mxu0 %v2572_v15  ;;  %v3901_v52 = vpack.c.bf16 %v574_v46, %v570_v45  ;;  %v573_v54 = vld [vmem:[#allocation9 + $0x60] sm:$0xff]  ;;  %v571_v55 = vld [vmem:[#allocation9 + $0x50] sm:$0xff]  ;;  %v3904_v56 = vpack.c.bf16 %v576_v48, %v572_v47  ;;  %v578_v58 = vld [vmem:[#allocation9 + $0x88] sm:$0xff] }
  0x69   : > { %2605 = vmatprep.subr.bf16.mxu1 %v2604_v19  ;;  %v575_v57 = vld [vmem:[#allocation9 + $0x70] sm:$0xff]  ;;  %v582_v59 = vld [vmem:[#allocation9 + $0xa8] sm:$0xff]  ;;  %v580_v60 = vld [vmem:[#allocation9 + $0x98] sm:$0xff]  ;;  %v3907_v62 = vpack.c.bf16 %v573_v54, %v569_v53 }
  0x6a   : > { %v584_v61 = vld [vmem:[#allocation9 + $0xb8] sm:$0xff]  ;;  %v278_v63 = vld [vmem:[%s3693_s9 + $0x8] sm:$0xff]  ;;  %v3912_v0 = vpack.c.bf16 %v575_v57, %v571_v55  ;;  %v3914_v1 = vpack.c.bf16 %v582_v59, %v578_v58  ;;  %v577_v2 = vld [vmem:[#allocation9 + $0x80] sm:$0xff] }
  0x6b   : > { %2575 = vmatpush1.bf16.msra.mxu0 %v2574_v25  ;;  %v581_v3 = vld [vmem:[#allocation9 + $0xa0] sm:$0xff]  ;;  %v579_v4 = vld [vmem:[#allocation9 + $0x90] sm:$0xff]  ;;  %v3917_v5 = vpack.c.bf16 %v584_v61, %v580_v60  ;;  %v586_v7 = vld [vmem:[#allocation9 + $0xc8] sm:$0xff] }
  0x6c   : > { %2607 = vmatpush1.bf16.msra.mxu1 %v2606_v26  ;;  %2577 = vmatprep.subr.bf16.mxu0 %v2576_v27  ;;  %v583_v6 = vld [vmem:[#allocation9 + $0xb0] sm:$0xff]  ;;  %v590_v9 = vld [vmem:[#allocation9 + $0xe8] sm:$0xff]  ;;  %v588_v10 = vld [vmem:[#allocation9 + $0xd8] sm:$0xff]  ;;  %v3922_v12 = vpack.c.bf16 %v581_v3, %v577_v2 }
  0x6d   : > { %2609 = vmatprep.subr.bf16.mxu1 %v2608_v31  ;;  %v592_v11 = vld [vmem:[#allocation9 + $0xf8] sm:$0xff]  ;;  %v279_v13 = vld [vmem:[%s3693_s9 + $0x10] sm:$0xff]  ;;  %v3927_v14 = vpack.c.bf16 %v583_v6, %v579_v4  ;;  %v3929_v15 = vpack.c.bf16 %v590_v9, %v586_v7  ;;  %v585_v16 = vld [vmem:[#allocation9 + $0xc0] sm:$0xff] }
  0x6e   : > { %v589_v17 = vld [vmem:[#allocation9 + $0xe0] sm:$0xff]  ;;  %v587_v18 = vld [vmem:[#allocation9 + $0xd0] sm:$0xff]  ;;  %v3932_v19 = vpack.c.bf16 %v592_v11, %v588_v10  ;;  %v594_v21 = vld [vmem:[#allocation9 + $0x108] sm:$0xff] }
  0x6f   : > { %2579 = vmatpush1.bf16.msra.mxu0 %v2578_v37  ;;  %v591_v20 = vld [vmem:[#allocation9 + $0xf0] sm:$0xff]  ;;  %v598_v22 = vld [vmem:[#allocation9 + $0x128] sm:$0xff]  ;;  %v596_v23 = vld [vmem:[#allocation9 + $0x118] sm:$0xff]  ;;  %v3937_v25 = vpack.c.bf16 %v589_v17, %v585_v16 }
  0x70   : > { %2611 = vmatpush1.bf16.msra.mxu1 %v2610_v38  ;;  %2613 = vmatprep.subr.bf16.mxu0 %v3891_v39  ;;  %v600_v24 = vld [vmem:[#allocation9 + $0x138] sm:$0xff]  ;;  %v3942_v27 = vpack.c.bf16 %v591_v20, %v587_v18  ;;  %v3944_v28 = vpack.c.bf16 %v598_v22, %v594_v21  ;;  %v593_v29 = vld [vmem:[#allocation9 + $0x100] sm:$0xff]  ;;  %v595_v31 = vld [vmem:[#allocation9 + $0x110] sm:$0xff] }
  0x71   : > { %2645 = vmatprep.subr.bf16.mxu1 %v3893_v43  ;;  %v280_v26 = vld [vmem:[%s3693_s9 + $0x18] sm:$0xff]  ;;  %v597_v30 = vld [vmem:[#allocation9 + $0x120] sm:$0xff]  ;;  %v3947_v32 = vpack.c.bf16 %v600_v24, %v596_v23  ;;  %v599_v33 = vld [vmem:[#allocation9 + $0x130] sm:$0xff]  ;;  %v347_v24 = vlaneseq }
  0x72   : > { %432 = vmatmul.mubr.f32.vlgmr.msra.gmra.mrb[0].mxu0 %v277_v49  ;;  %v602_v34 = vld [vmem:[#allocation9 + $0x148] sm:$0xff]  ;;  %v604_v36 = vld [vmem:[#allocation9 + $0x158] sm:$0xff]  ;;  %v3952_v38 = vpack.c.bf16 %v597_v30, %v593_v29  ;;  %v3956_v40 = vpack.c.bf16 %v599_v33, %v595_v31  ;;  %v601_v42 = vld [vmem:[#allocation9 + $0x140] sm:$0xff] }
  0x73   : > { %521 = vmatmul.mubr.f32.vlgmr.msra.gmra.mrb[0].mxu1 %v277_v49  ;;  %2615 = vmatpush1.bf16.msra.mxu0 %v3896_v50  ;;  %v606_v35 = vld [vmem:[#allocation9 + $0x168] sm:$0xff]  ;;  %v608_v37 = vld [vmem:[#allocation9 + $0x178] sm:$0xff]  ;;  %v605_v44 = vld [vmem:[#allocation9 + $0x160] sm:$0xff] }
  0x74   : > { %2647 = vmatpush1.bf16.msra.mxu1 %v3899_v51  ;;  %2617 = vmatprep.subr.bf16.mxu0 %v3901_v52  ;;  %v3958_v41 = vpack.c.bf16 %v606_v35, %v602_v34  ;;  %v603_v45 = vld [vmem:[#allocation9 + $0x150] sm:$0xff]  ;;  %v3961_v46 = vpack.c.bf16 %v608_v37, %v604_v36  ;;  %v610_v48 = vld [vmem:[#allocation9 + $0x188] sm:$0xff]  ;;  %v612_v53 = vld [vmem:[#allocation9 + $0x198] sm:$0xff]  ;;  %v3966_v55 = vpack.c.bf16 %v605_v44, %v601_v42 }
  0x75   : > { %2649 = vmatprep.subr.bf16.mxu1 %v3904_v56  ;;  %437 = vmatprep.mubr.f32.mxu0 %v3566_v8  ;;  %v607_v47 = vld [vmem:[#allocation9 + $0x170] sm:$0xff]  ;;  %v614_v49 = vld [vmem:[#allocation9 + $0x1a8] sm:$0xff]  ;;  %v616_v54 = vld [vmem:[#allocation9 + $0x1b8] sm:$0xff] }
  0x76   : > { %526 = vmatprep.mubr.f32.mxu1 %v3566_v8  ;;  %438 = vmatmul.mubr.f32.gmra.mrb[2].mxu0 %v278_v63  ;;  %v3970_v57 = vpack.c.bf16 %v607_v47, %v603_v45  ;;  %v3972_v58 = vpack.c.bf16 %v614_v49, %v610_v48  ;;  %v609_v59 = vld [vmem:[#allocation9 + $0x180] sm:$0xff]  ;;  %v611_v61 = vld [vmem:[#allocation9 + $0x190] sm:$0xff]  ;;  %v618_v3 = vld [vmem:[#allocation9 + $0x1c8] sm:$0xff] }
  0x77   : > { %2619 = vmatpush1.bf16.msra.mxu0 %v3907_v62  ;;  %527 = vmatmul.mubr.f32.gmra.mrb[2].mxu1 %v278_v63  ;;  %v613_v60 = vld [vmem:[#allocation9 + $0x1a0] sm:$0xff]  ;;  %v3975_v63 = vpack.c.bf16 %v616_v54, %v612_v53  ;;  %v615_v2 = vld [vmem:[#allocation9 + $0x1b0] sm:$0xff]  ;;  %v622_v4 = vld [vmem:[#allocation9 + $0x1e8] sm:$0xff] }
  0x78   : > { %2651 = vmatpush1.bf16.msra.mxu1 %v3912_v0  ;;  %2621 = vmatprep.subr.bf16.mxu0 %v3914_v1  ;;  %v620_v6 = vld [vmem:[#allocation9 + $0x1d8] sm:$0xff]  ;;  %v3978_v9 = vpack.c.bf16 %v613_v60, %v609_v59  ;;  %v3982_v10 = vpack.c.bf16 %v615_v2, %v611_v61  ;;  %v3984_v11 = vpack.c.bf16 %v622_v4, %v618_v3  ;;  %v621_v16 = vld [vmem:[#allocation9 + $0x1e0] sm:$0xff]  ;;  %v619_v18 = vld [vmem:[#allocation9 + $0x1d0] sm:$0xff] }
  0x79   : > { %2653 = vmatprep.subr.bf16.mxu1 %v3917_v5  ;;  %443 = vmatprep.mubr.f32.mxu0 %v3566_v8  ;;  %v624_v7 = vld [vmem:[#allocation9 + $0x1f8] sm:$0xff]  ;;  %v623_v20 = vld [vmem:[#allocation9 + $0x1f0] sm:$0xff]  ;;  %v625_v23 = vld [vmem:[#allocation4] sm:$0xff] }
  0x7a   : > { %532 = vmatprep.mubr.f32.mxu1 %v3566_v8  ;;  %444 = vmatmul.mubr.f32.gmra.mrb[4].mxu0 %v279_v13  ;;  %v3987_v17 = vpack.c.bf16 %v624_v7, %v620_v6  ;;  %v3994_v22 = vpack.c.bf16 %v623_v20, %v619_v18  ;;  %v345_v30 = vld [vmem:[%s4476_s4] sm:$0xf]  ;;  %v626_v20 = vld [vmem:[#allocation5] sm:$0xff] }
  0x7b   : > { %2623 = vmatpush1.bf16.msra.mxu0 %v3922_v12  ;;  %533 = vmatmul.mubr.f32.gmra.mrb[4].mxu1 %v279_v13  ;;  %v617_v13 = vld [vmem:[#allocation9 + $0x1c0] sm:$0xff] }
  0x7c   : > { %2655 = vmatpush1.bf16.msra.mxu1 %v3927_v14  ;;  %2625 = vmatprep.subr.bf16.mxu0 %v3929_v15  ;;  %v3990_v21 = vpack.c.bf16 %v621_v16, %v617_v13 }
  0x7d   : > { %2657 = vmatprep.subr.bf16.mxu1 %v3932_v19  ;;  %449 = vmatprep.mubr.f32.mxu0 %v3566_v8 }
  0x7e   : > { %538 = vmatprep.mubr.f32.mxu1 %v3566_v8  ;;  %450 = vmatmul.mubr.f32.gmra.mrb[6].mxu0 %v280_v26 }
  0x7f   : > { %2627 = vmatpush1.bf16.msra.mxu0 %v3937_v25  ;;  %539 = vmatmul.mubr.f32.gmra.mrb[6].mxu1 %v280_v26  ;;  %v4035_v26 = vshrl.u32 %v347_v24, 7 }
  0x80   : > { %2659 = vmatpush1.bf16.msra.mxu1 %v3942_v27  ;;  %2629 = vmatprep.subr.bf16.mxu0 %v3944_v28 }
  0x81   : > { %2661 = vmatprep.subr.bf16.mxu1 %v3947_v32  ;;  %698 = vmatprep.mubr.f32.mxu0 %v3566_v8  ;;  %v349_v29 = vsub.s32 0, %v4035_v26  ;;  %v353_v31 = vsub.s32 1, %v4035_v26  ;;  %v357_v36 = vsub.s32 2, %v4035_v26  ;;  %v361_v54 = vsub.s32 3, %v4035_v26 }
  0x82   : > { %769 = vmatprep.mubr.f32.mxu1 %v3566_v8 }
  0x83   : > { %2631 = vmatpush1.bf16.msra.mxu0 %v3952_v38  ;;  %v4044_v33 = vrot.slane %v345_v30, %v349_v29  ;;  %v4048_v34 = vrot.slane %v345_v30, %v353_v31  ;;  %v4055_v49 = vrot.slane %v345_v30, %v357_v36  ;;  %v4061_v60 = vrot.slane %v345_v30, %v361_v54 }
  0x84   : > { %2663 = vmatpush1.bf16.msra.mxu1 %v3956_v40  ;;  %2633 = vmatprep.subr.bf16.mxu0 %v3958_v41 }
  0x85   : > { %2665 = vmatprep.subr.bf16.mxu1 %v3961_v46 }
  0x87   : > { %2635 = vmatpush1.bf16.msra.mxu0 %v3966_v55 }
  0x88   : > { %2667 = vmatpush1.bf16.msra.mxu1 %v3970_v57  ;;  %2637 = vmatprep.subr.bf16.mxu0 %v3972_v58 }
  0x89   : > { %2669 = vmatprep.subr.bf16.mxu1 %v3975_v63 }
  0x8b   : > { %2639 = vmatpush1.bf16.msra.mxu0 %v3978_v9 }
  0x8c   : > { %2671 = vmatpush1.bf16.msra.mxu1 %v3982_v10  ;;  %2641 = vmatprep.subr.bf16.mxu0 %v3984_v11 }
  0x8d   : > { %2673 = vmatprep.subr.bf16.mxu1 %v3987_v17 }
  0x8f   : > { %2643 = vmatpush1.bf16.msra.mxu0 %v3990_v21 }
  0x90   : > { %2675 = vmatpush1.bf16.msra.mxu1 %v3994_v22  ;;  %2677 = vmatprep.subr.bf16.mxu0 %v3891_v39 }
  0x91   : > { %2709 = vmatprep.subr.bf16.mxu1 %v3893_v43 }
  0x92   : > { %699 = vmatmul.mubr.f32.vlgmr.msra.gmra.mrb[0].mxu0 %v625_v23 }
  0x93   : > { %770 = vmatmul.mubr.f32.vlgmr.msra.gmra.mrb[0].mxu1 %v625_v23  ;;  %2679 = vmatpush1.bf16.msra.mxu0 %v3896_v50 }
  0x94   : > { %2711 = vmatpush1.bf16.msra.mxu1 %v3899_v51  ;;  %2681 = vmatprep.subr.bf16.mxu0 %v3901_v52 }
  0x95   : > { %2713 = vmatprep.subr.bf16.mxu1 %v3904_v56  ;;  %876 = vmatprep.mubr.f32.mxu0 %v3566_v8 }
  0x96   : > { %947 = vmatprep.mubr.f32.mxu1 %v3566_v8 }
  0x97   : > { %2683 = vmatpush1.bf16.msra.mxu0 %v3907_v62 }
  0x98   : > { %2715 = vmatpush1.bf16.msra.mxu1 %v3912_v0  ;;  %2685 = vmatprep.subr.bf16.mxu0 %v3914_v1 }
  0x99   : > { %2717 = vmatprep.subr.bf16.mxu1 %v3917_v5 }
  0x9b   : > { %2687 = vmatpush1.bf16.msra.mxu0 %v3922_v12 }
  0x9c   : > { %2719 = vmatpush1.bf16.msra.mxu1 %v3927_v14  ;;  %2689 = vmatprep.subr.bf16.mxu0 %v3929_v15 }
  0x9d   : > { %2721 = vmatprep.subr.bf16.mxu1 %v3932_v19 }
  0x9f   : > { %2691 = vmatpush1.bf16.msra.mxu0 %v3937_v25 }
  0xa0   : > { %2723 = vmatpush1.bf16.msra.mxu1 %v3942_v27  ;;  %2693 = vmatprep.subr.bf16.mxu0 %v3944_v28 }
  0xa1   : > { %2725 = vmatprep.subr.bf16.mxu1 %v3947_v32 }
  0xa3   : > { %2695 = vmatpush1.bf16.msra.mxu0 %v3952_v38 }
  0xa4   : > { %2727 = vmatpush1.bf16.msra.mxu1 %v3956_v40  ;;  %2697 = vmatprep.subr.bf16.mxu0 %v3958_v41 }
  0xa5   : > { %2729 = vmatprep.subr.bf16.mxu1 %v3961_v46 }
  0xa7   : > { %2699 = vmatpush1.bf16.msra.mxu0 %v3966_v55 }
  0xa8   : > { %2731 = vmatpush1.bf16.msra.mxu1 %v3970_v57  ;;  %2701 = vmatprep.subr.bf16.mxu0 %v3972_v58 }
  0xa9   : > { %2733 = vmatprep.subr.bf16.mxu1 %v3975_v63 }
  0xab   : > { %2703 = vmatpush1.bf16.msra.mxu0 %v3978_v9 }
  0xac   : > { %2735 = vmatpush1.bf16.msra.mxu1 %v3982_v10  ;;  %2705 = vmatprep.subr.bf16.mxu0 %v3984_v11 }
  0xad   : > { %2737 = vmatprep.subr.bf16.mxu1 %v3987_v17 }
  0xaf   : > { %2707 = vmatpush1.bf16.msra.mxu0 %v3990_v21 }
  0xb0   : > { %2739 = vmatpush1.bf16.msra.mxu1 %v3994_v22  ;;  %2741 = vmatprep.subr.bf16.mxu0 %v3891_v39 }
  0xb1   : > { %2773 = vmatprep.subr.bf16.mxu1 %v3893_v43 }
 0x165   : > { %v700_v35 = vpop.f32.mrb[0].mxu0 }
 0x166   : > { %v3188_v37 = vadd.f32 %v700_v35, %v4044_v33  ;;  %v771_v42 = vpop.f32.mrb[0].mxu1  ;;  %v702_v44 = vpop.f32.mrb[1].mxu0 }
 0x167   : > { %v3189_v45 = vadd.f32 %v702_v44, %v4048_v34  ;;  %v773_v47 = vpop.f32.mrb[1].mxu1  ;;  %v3196_v59 = vadd.f32 %v771_v42, %v4055_v49 }
 0x168   : > { %v2516_v48 = vmul.f32 -1.442695, %v3188_v37  ;;  %v3197_v2 = vadd.f32 %v773_v47, %v4061_v60 }
 0x169   : > { %v2517_v53 = vmul.f32 -1.442695, %v3189_v45  ;;  %v2518_v61 = vmul.f32 -1.442695, %v3196_v59 }
 0x16a   : > { %3301 = vpow2.f32 %v2516_v48 }
 0x16b   : > { %3303 = vpow2.f32 %v2517_v53 }
 0x16c   : > { %3305 = vpow2.f32 %v2518_v61 }
 0x16d   : > { %3307 = vtanh.f32 %v3197_v2 }
 0x174   : > { %v3302_v3 = vpop.eup %3301 }
 0x175   : > { %v789_v4 = vadd.f32 1.0, %v3302_v3  ;;  %v3304_v6 = vpop.eup %3303 }
 0x176   : > { %v790_v7 = vadd.f32 1.0, %v3304_v6  ;;  %v3306_v13 = vpop.eup %3305 }
 0x177   : > { %3309 = vrcp.f32 %v789_v4  ;;  %v3308_v16 = vpop.eup %3307  ;;  %v791_v35 = vadd.f32 1.0, %v3306_v13 }
 0x178   : > { %3311 = vrcp.f32 %v790_v7 }
 0x179   : > { %3313 = vrcp.f32 %v791_v35 }
 0x181   : > { %v3310_v18 = vpop.eup %3309 }
 0x182   : > { %v800_v23 = vmul.f32 %v3310_v18, %v3308_v16  ;;  %v3312_v24 = vpop.eup %3311 }
 0x183   : > { %v799_v30 = vmul.f32 %v3312_v24, %v626_v20  ;;  %v3314_v42 = vpop.eup %3313 }
 0x185   : > { %v4064_v37 = vadd.f32 %v800_v23, %v799_v30 }
 0x187   : > { %3315 = vtanh.f32 %v4064_v37 }
 0x191   : > { %v3316_v44 = vpop.eup %3315 }
 0x192   : > { %v4067_v45 = vmul.f32 %v3316_v44, %v3314_v42 }
 0x194   : > { %877 = vmatmul.mubr.f32.vlgmr.msra.gmra.mrb[2].mxu0 %v4067_v45  ;;  %948 = vmatmul.mubr.f32.vlgmr.msra.gmra.mrb[2].mxu1 %v4067_v45 }
 0x195   : > { %2743 = vmatpush1.bf16.msra.mxu0 %v3896_v50  ;;  %2775 = vmatpush1.bf16.msra.mxu1 %v3899_v51 }
 0x196   : > { %2745 = vmatprep.subr.bf16.mxu0 %v3901_v52  ;;  %2777 = vmatprep.subr.bf16.mxu1 %v3904_v56 }
 0x197   : > { %1055 = vmatprep.mubr.f32.mxu0 %v3566_v8  ;;  %1126 = vmatprep.mubr.f32.mxu1 %v3566_v8 }
 0x199   : > { %2747 = vmatpush1.bf16.msra.mxu0 %v3907_v62  ;;  %2779 = vmatpush1.bf16.msra.mxu1 %v3912_v0 }
 0x19a   : > { %2749 = vmatprep.subr.bf16.mxu0 %v3914_v1  ;;  %2781 = vmatprep.subr.bf16.mxu1 %v3917_v5 }
 0x19d   : > { %2751 = vmatpush1.bf16.msra.mxu0 %v3922_v12  ;;  %2783 = vmatpush1.bf16.msra.mxu1 %v3927_v14 }
 0x19e   : > { %2753 = vmatprep.subr.bf16.mxu0 %v3929_v15  ;;  %2785 = vmatprep.subr.bf16.mxu1 %v3932_v19 }
 0x1a1   : > { %2755 = vmatpush1.bf16.msra.mxu0 %v3937_v25  ;;  %2787 = vmatpush1.bf16.msra.mxu1 %v3942_v27 }
 0x1a2   : > { %2757 = vmatprep.subr.bf16.mxu0 %v3944_v28  ;;  %2789 = vmatprep.subr.bf16.mxu1 %v3947_v32 }
 0x1a5   : > { %2759 = vmatpush1.bf16.msra.mxu0 %v3952_v38  ;;  %2791 = vmatpush1.bf16.msra.mxu1 %v3956_v40 }
 0x1a6   : > { %2761 = vmatprep.subr.bf16.mxu0 %v3958_v41  ;;  %2793 = vmatprep.subr.bf16.mxu1 %v3961_v46 }
 0x1a9   : > { %2763 = vmatpush1.bf16.msra.mxu0 %v3966_v55  ;;  %2795 = vmatpush1.bf16.msra.mxu1 %v3970_v57 }
 0x1aa   : > { %2765 = vmatprep.subr.bf16.mxu0 %v3972_v58  ;;  %2797 = vmatprep.subr.bf16.mxu1 %v3975_v63 }
 0x1ad   : > { %2767 = vmatpush1.bf16.msra.mxu0 %v3978_v9  ;;  %2799 = vmatpush1.bf16.msra.mxu1 %v3982_v10 }
 0x1ae   : > { %2769 = vmatprep.subr.bf16.mxu0 %v3984_v11  ;;  %2801 = vmatprep.subr.bf16.mxu1 %v3987_v17 }
 0x1b1   : > { %2771 = vmatpush1.bf16.msra.mxu0 %v3990_v21  ;;  %2803 = vmatpush1.bf16.msra.mxu1 %v3994_v22 }
 0x1b2   : > { %2805 = vmatprep.subr.bf16.mxu0 %v3891_v39  ;;  %2837 = vmatprep.subr.bf16.mxu1 %v3893_v43 }
 0x267   : > { %v878_v47 = vpop.f32.mrb[2].mxu0  ;;  %v949_v48 = vpop.f32.mrb[2].mxu1 }
 0x268   : > { %v3190_v53 = vadd.f32 %v878_v47, %v4044_v33  ;;  %v880_v59 = vpop.f32.mrb[3].mxu0  ;;  %v951_v61 = vpop.f32.mrb[3].mxu1  ;;  %v3198_v6 = vadd.f32 %v949_v48, %v4055_v49 }
 0x269   : > { %v3191_v2 = vadd.f32 %v880_v59, %v4048_v34  ;;  %v3199_v7 = vadd.f32 %v951_v61, %v4061_v60  ;;  %v1350_v61 = vld [vmem:[#allocation6 + $0x10] sm:$0xff] }
 0x26a   : > { %v2519_v3 = vmul.f32 -1.442695, %v3190_v53  ;;  %v2521_v13 = vmul.f32 -1.442695, %v3198_v6  ;;  %v1359_v6 = vld [vmem:[#allocation6 + $0x58] sm:$0xff] }
 0x26b   : > { %v2520_v4 = vmul.f32 -1.442695, %v3191_v2  ;;  %v1354_v2 = vld [vmem:[#allocation6 + $0x30] sm:$0xff] }
 0x26c   : > { %3317 = vpow2.f32 %v2519_v3  ;;  %v1357_v3 = vld [vmem:[#allocation6 + $0x48] sm:$0xff] }
 0x26d   : > { %3319 = vpow2.f32 %v2520_v4  ;;  %v1361_v4 = vld [vmem:[#allocation6 + $0x68] sm:$0xff] }
 0x26e   : > { %3321 = vtanh.f32 %v3199_v7  ;;  %v1363_v7 = vld [vmem:[#allocation6 + $0x78] sm:$0xff] }
 0x26f   : > { %3323 = vpow2.f32 %v2521_v13 }
 0x276   : > { %v3318_v39 = vpop.eup %3317 }
 0x277   : > { %v967_v16 = vadd.f32 1.0, %v3318_v39  ;;  %v3320_v43 = vpop.eup %3319 }
 0x278   : > { %v968_v18 = vadd.f32 1.0, %v3320_v43  ;;  %v3322_v20 = vpop.eup %3321  ;;  %v2902_v43 = vpack.c.bf16 %v1354_v2, %v1350_v61  ;;  %v1382_v61 = vld [vmem:[#allocation6 + $0x110] sm:$0xff] }
 0x279   : > { %3325 = vrcp.f32 %v967_v16  ;;  %v3324_v23 = vpop.eup %3323  ;;  %v1386_v2 = vld [vmem:[#allocation6 + $0x130] sm:$0xff] }
 0x27a   : > { %3327 = vrcp.f32 %v968_v18  ;;  %v969_v42 = vadd.f32 1.0, %v3324_v23  ;;  %v1356_v18 = vld [vmem:[#allocation6 + $0x40] sm:$0xff] }
 0x27c   : > { %3329 = vrcp.f32 %v969_v42  ;;  %v1362_v42 = vld [vmem:[#allocation6 + $0x70] sm:$0xff] }
 0x283   : > { %v3326_v24 = vpop.eup %3325 }
 0x284   : > { %v978_v35 = vmul.f32 %v3326_v24, %v3322_v20  ;;  %v3328_v30 = vpop.eup %3327  ;;  %v1360_v20 = vld [vmem:[#allocation6 + $0x60] sm:$0xff]  ;;  %v2872_v24 = vpack.c.bf16 %v1361_v4, %v1357_v3  ;;  %v1389_v3 = vld [vmem:[#allocation6 + $0x148] sm:$0xff] }
 0x285   : > { %v977_v44 = vmul.f32 %v3328_v30, %v4064_v37  ;;  %v1352_v37 = vld [vmem:[#allocation6 + $0x20] sm:$0xff]  ;;  %v1358_v30 = vld [vmem:[#allocation6 + $0x50] sm:$0xff]  ;;  %v1393_v4 = vld [vmem:[#allocation6 + $0x168] sm:$0xff] }
 0x286   : > { %v3330_v48 = vpop.eup %3329 }
 0x287   : > { %v4110_v47 = vadd.f32 %v978_v35, %v977_v44  ;;  %v2904_v35 = vpack.c.bf16 %v1363_v7, %v1359_v6  ;;  %v1365_v44 = vld [vmem:[#allocation6 + $0x88] sm:$0xff]  ;;  %v1391_v6 = vld [vmem:[#allocation6 + $0x158] sm:$0xff] }
 0x288   : > { %v1395_v7 = vld [vmem:[#allocation6 + $0x178] sm:$0xff] }
 0x289   : > { %3331 = vtanh.f32 %v4110_v47 }
 0x293   : > { %v3332_v53 = vpop.eup %3331 }
 0x294   : > { %v4113_v59 = vmul.f32 %v3332_v53, %v3330_v48  ;;  %v1367_v48 = vld [vmem:[#allocation6 + $0x98] sm:$0xff] }
 0x295   : > { %v1371_v53 = vld [vmem:[#allocation6 + $0xb8] sm:$0xff] }
 0x296   : > { %1056 = vmatmul.mubr.f32.vlgmr.msra.gmra.mrb[4].mxu0 %v4113_v59  ;;  %1127 = vmatmul.mubr.f32.vlgmr.msra.gmra.mrb[4].mxu1 %v4113_v59 }
 0x297   : > { %2807 = vmatpush1.bf16.msra.mxu0 %v3896_v50  ;;  %2839 = vmatpush1.bf16.msra.mxu1 %v3899_v51  ;;  %v1349_v50 = vld [vmem:[#allocation6 + $0x8] sm:$0xff] }
 0x298   : > { %2809 = vmatprep.subr.bf16.mxu0 %v3901_v52  ;;  %2841 = vmatprep.subr.bf16.mxu1 %v3904_v56  ;;  %v1353_v51 = vld [vmem:[#allocation6 + $0x28] sm:$0xff]  ;;  %v1351_v52 = vld [vmem:[#allocation6 + $0x18] sm:$0xff] }
 0x299   : > { %1234 = vmatprep.mubr.f32.mxu0 %v3566_v8  ;;  %1305 = vmatprep.mubr.f32.mxu1 %v3566_v8  ;;  %v2868_v56 = vpack.c.bf16 %v1353_v51, %v1349_v50  ;;  %v2874_v50 = vpack.c.bf16 %v1360_v20, %v1356_v18  ;;  %v2906_v51 = vpack.c.bf16 %v1362_v42, %v1358_v30  ;;  %v1397_v30 = vld [vmem:[#allocation6 + $0x188] sm:$0xff] }
 0x29a   : > { %v2888_v18 = vpack.c.bf16 %v1393_v4, %v1389_v3  ;;  %v2920_v20 = vpack.c.bf16 %v1395_v7, %v1391_v6  ;;  %v1401_v42 = vld [vmem:[#allocation6 + $0x1a8] sm:$0xff]  ;;  %v1645_v4 = vld [vmem:[#allocation9 + $0x278] sm:$0xff]  ;;  %v1638_v6 = vld [vmem:[#allocation9 + $0x240] sm:$0xff] }
 0x29b   : > { %2811 = vmatpush1.bf16.msra.mxu0 %v3907_v62  ;;  %2843 = vmatpush1.bf16.msra.mxu1 %v3912_v0  ;;  %v1355_v62 = vld [vmem:[#allocation6 + $0x38] sm:$0xff]  ;;  %v1642_v7 = vld [vmem:[#allocation9 + $0x260] sm:$0xff] }
 0x29c   : > { %2813 = vmatprep.subr.bf16.mxu0 %v3914_v1  ;;  %2845 = vmatprep.subr.bf16.mxu1 %v3917_v5  ;;  %v2900_v0 = vpack.c.bf16 %v1355_v62, %v1351_v52  ;;  %v1364_v52 = vld [vmem:[#allocation6 + $0x80] sm:$0xff] }
 0x29f   : > { %2815 = vmatpush1.bf16.msra.mxu0 %v3922_v12  ;;  %2847 = vmatpush1.bf16.msra.mxu1 %v3927_v14 }
 0x2a0   : > { %2817 = vmatprep.subr.bf16.mxu0 %v3929_v15  ;;  %2849 = vmatprep.subr.bf16.mxu1 %v3932_v19 }
 0x2a3   : > { %2819 = vmatpush1.bf16.msra.mxu0 %v3937_v25  ;;  %2851 = vmatpush1.bf16.msra.mxu1 %v3942_v27 }
 0x2a4   : > { %2821 = vmatprep.subr.bf16.mxu0 %v3944_v28  ;;  %2853 = vmatprep.subr.bf16.mxu1 %v3947_v32 }
 0x2a7   : > { %2823 = vmatpush1.bf16.msra.mxu0 %v3952_v38  ;;  %2855 = vmatpush1.bf16.msra.mxu1 %v3956_v40 }
 0x2a8   : > { %2825 = vmatprep.subr.bf16.mxu0 %v3958_v41  ;;  %2857 = vmatprep.subr.bf16.mxu1 %v3961_v46 }
 0x2ab   : > { %2827 = vmatpush1.bf16.msra.mxu0 %v3966_v55  ;;  %2859 = vmatpush1.bf16.msra.mxu1 %v3970_v57 }
 0x2ac   : > { %2829 = vmatprep.subr.bf16.mxu0 %v3972_v58  ;;  %2861 = vmatprep.subr.bf16.mxu1 %v3975_v63 }
 0x2af   : > { %2831 = vmatpush1.bf16.msra.mxu0 %v3978_v9  ;;  %2863 = vmatpush1.bf16.msra.mxu1 %v3982_v10 }
 0x2b0   : > { %2833 = vmatprep.subr.bf16.mxu0 %v3984_v11  ;;  %2865 = vmatprep.subr.bf16.mxu1 %v3987_v17 }
 0x2b3   : > { %2835 = vmatpush1.bf16.msra.mxu0 %v3990_v21  ;;  %2867 = vmatpush1.bf16.msra.mxu1 %v3994_v22  ;;  %v1348_v22 = vld [vmem:[#allocation6] sm:$0xff] }
 0x2b4   : > { %2869 = vmatprep.subr.bf16.mxu0 %v2868_v56  ;;  %2901 = vmatprep.subr.bf16.mxu1 %v2900_v0  ;;  %v2870_v16 = vpack.c.bf16 %v1352_v37, %v1348_v22  ;;  %v1368_v56 = vld [vmem:[#allocation6 + $0xa0] sm:$0xff]  ;;  %v2908_v0 = vpack.c.bf16 %v1371_v53, %v1367_v48 }
 0x369   : > { %v1057_v1 = vpop.f32.mrb[4].mxu0  ;;  %v1128_v5 = vpop.f32.mrb[4].mxu1 }
 0x36a   : > { %v3192_v12 = vadd.f32 %v1057_v1, %v4044_v33  ;;  %v1059_v14 = vpop.f32.mrb[5].mxu0  ;;  %v1130_v15 = vpop.f32.mrb[5].mxu1  ;;  %v3200_v28 = vadd.f32 %v1128_v5, %v4055_v49  ;;  %v1366_v1 = vld [vmem:[#allocation6 + $0x90] sm:$0xff] }
 0x36b   : > { %v3193_v19 = vadd.f32 %v1059_v14, %v4048_v34  ;;  %v3201_v32 = vadd.f32 %v1130_v15, %v4061_v60  ;;  %v1370_v5 = vld [vmem:[#allocation6 + $0xb0] sm:$0xff]  ;;  %v1377_v14 = vld [vmem:[#allocation6 + $0xe8] sm:$0xff]  ;;  %v1375_v15 = vld [vmem:[#allocation6 + $0xd8] sm:$0xff] }
 0x36c   : > { %v2522_v25 = vmul.f32 -1.442695, %v3192_v12  ;;  %v2524_v38 = vmul.f32 -1.442695, %v3200_v28  ;;  %v1373_v12 = vld [vmem:[#allocation6 + $0xc8] sm:$0xff]  ;;  %v1372_v28 = vld [vmem:[#allocation6 + $0xc0] sm:$0xff] }
 0x36d   : > { %v2523_v27 = vmul.f32 -1.442695, %v3193_v19  ;;  %v1379_v19 = vld [vmem:[#allocation6 + $0xf8] sm:$0xff] }
 0x36e   : > { %3333 = vpow2.f32 %v2522_v25  ;;  %v2878_v25 = vpack.c.bf16 %v1368_v56, %v1364_v52  ;;  %v2892_v52 = vpack.c.bf16 %v1401_v42, %v1397_v30  ;;  %v1653_v42 = vld [vmem:[#allocation9 + $0x2b8] sm:$0xff] }
 0x36f   : > { %3335 = vpow2.f32 %v2523_v27  ;;  %v2910_v27 = vpack.c.bf16 %v1370_v5, %v1366_v1  ;;  %v1405_v1 = vld [vmem:[#allocation6 + $0x1c8] sm:$0xff] }
 0x370   : > { %3337 = vtanh.f32 %v3201_v32  ;;  %v1376_v32 = vld [vmem:[#allocation6 + $0xe0] sm:$0xff]  ;;  %v1409_v5 = vld [vmem:[#allocation6 + $0x1e8] sm:$0xff] }
 0x371   : > { %3339 = vpow2.f32 %v2524_v38  ;;  %v2880_v38 = vpack.c.bf16 %v1377_v14, %v1373_v12  ;;  %v1407_v12 = vld [vmem:[#allocation6 + $0x1d8] sm:$0xff] }
 0x372   : > { %v1411_v14 = vld [vmem:[#allocation6 + $0x1f8] sm:$0xff] }
 0x378   : > { %v3334_v40 = vpop.eup %3333 }
 0x379   : > { %v1146_v41 = vadd.f32 1.0, %v3334_v40  ;;  %v3336_v46 = vpop.eup %3335  ;;  %v2912_v40 = vpack.c.bf16 %v1379_v19, %v1375_v15 }
 0x37a   : > { %v1147_v55 = vadd.f32 1.0, %v3336_v46  ;;  %v3338_v57 = vpop.eup %3337  ;;  %v1378_v46 = vld [vmem:[#allocation6 + $0xf0] sm:$0xff] }
 0x37b   : > { %3341 = vrcp.f32 %v1146_v41  ;;  %v3340_v58 = vpop.eup %3339  ;;  %v1374_v41 = vld [vmem:[#allocation6 + $0xd0] sm:$0xff] }
 0x37c   : > { %3343 = vrcp.f32 %v1147_v55  ;;  %v1148_v11 = vadd.f32 1.0, %v3340_v58  ;;  %v1381_v55 = vld [vmem:[#allocation6 + $0x108] sm:$0xff]  ;;  %v1383_v58 = vld [vmem:[#allocation6 + $0x118] sm:$0xff] }
 0x37e   : > { %3345 = vrcp.f32 %v1148_v11  ;;  %v1380_v11 = vld [vmem:[#allocation6 + $0x100] sm:$0xff] }
 0x385   : > { %v3342_v63 = vpop.eup %3341 }
 0x386   : > { %v1157_v9 = vmul.f32 %v3342_v63, %v3338_v57  ;;  %v3344_v10 = vpop.eup %3343  ;;  %v1385_v57 = vld [vmem:[#allocation6 + $0x128] sm:$0xff]  ;;  %v1387_v63 = vld [vmem:[#allocation6 + $0x138] sm:$0xff] }
 0x387   : > { %v1156_v17 = vmul.f32 %v3344_v10, %v4110_v47  ;;  %v1369_v47 = vld [vmem:[#allocation6 + $0xa8] sm:$0xff]  ;;  %v2914_v10 = vpack.c.bf16 %v1378_v46, %v1374_v41  ;;  %v2884_v22 = vpack.c.bf16 %v1385_v57, %v1381_v55  ;;  %v2916_v37 = vpack.c.bf16 %v1387_v63, %v1383_v58  ;;  %v1633_v57 = vld [vmem:[#allocation9 + $0x218] sm:$0xff] }
 0x388   : > { %v3346_v13 = vpop.eup %3345  ;;  %v2876_v62 = vpack.c.bf16 %v1369_v47, %v1365_v44  ;;  %v1399_v44 = vld [vmem:[#allocation6 + $0x198] sm:$0xff]  ;;  %v1635_v55 = vld [vmem:[#allocation9 + $0x228] sm:$0xff] }
 0x389   : > { %v4154_v21 = vadd.f32 %v1157_v9, %v1156_v17  ;;  %v2882_v9 = vpack.c.bf16 %v1376_v32, %v1372_v28  ;;  %v1384_v17 = vld [vmem:[#allocation6 + $0x120] sm:$0xff]  ;;  %v1403_v47 = vld [vmem:[#allocation6 + $0x1b8] sm:$0xff]  ;;  %v2928_v28 = vpack.c.bf16 %v1411_v14, %v1407_v12 }
 0x38a   : > { %v2924_v56 = vpack.c.bf16 %v1403_v47, %v1399_v44  ;;  %v1408_v32 = vld [vmem:[#allocation6 + $0x1e0] sm:$0xff]  ;;  %v1637_v63 = vld [vmem:[#allocation9 + $0x238] sm:$0xff] }
 0x38b   : > { %3347 = vtanh.f32 %v4154_v21  ;;  %v1646_v44 = vld [vmem:[#allocation9 + $0x280] sm:$0xff] }
 0x38c   : > { %v1650_v47 = vld [vmem:[#allocation9 + $0x2a0] sm:$0xff] }
 0x38d   : > { %v1654_v12 = vld [vmem:[#allocation9 + $0x2c0] sm:$0xff] }
 0x38e   : > { %v1658_v14 = vld [vmem:[#allocation9 + $0x2e0] sm:$0xff] }
 0x395   : > { %v3348_v39 = vpop.eup %3347 }
 0x396   : > { %v4157_v23 = vmul.f32 %v3348_v39, %v3346_v13  ;;  %v2886_v13 = vpack.c.bf16 %v1384_v17, %v1380_v11  ;;  %v2918_v39 = vpack.c.bf16 %v1386_v2, %v1382_v61  ;;  %v1632_v17 = vld [vmem:[#allocation9 + $0x210] sm:$0xff]  ;;  %v1643_v61 = vld [vmem:[#allocation9 + $0x268] sm:$0xff]  ;;  %v1641_v2 = vld [vmem:[#allocation9 + $0x258] sm:$0xff] }
 0x398   : > { %1235 = vmatmul.mubr.f32.vlgmr.msra.gmra.mrb[6].mxu0 %v4157_v23  ;;  %1306 = vmatmul.mubr.f32.vlgmr.msra.gmra.mrb[6].mxu1 %v4157_v23 }
 0x399   : > { %2871 = vmatpush1.bf16.msra.mxu0 %v2870_v16  ;;  %2903 = vmatpush1.bf16.msra.mxu1 %v2902_v43  ;;  %v1388_v16 = vld [vmem:[#allocation6 + $0x140] sm:$0xff] }
 0x39a   : > { %2873 = vmatprep.subr.bf16.mxu0 %v2872_v24  ;;  %2905 = vmatprep.subr.bf16.mxu1 %v2904_v35  ;;  %v1392_v43 = vld [vmem:[#allocation6 + $0x160] sm:$0xff]  ;;  %v1390_v24 = vld [vmem:[#allocation6 + $0x150] sm:$0xff] }
 0x39b   : > { %1499 = vmatprep.mubr.f32.mxu0 %v3566_v8  ;;  %1588 = vmatprep.mubr.f32.mxu1 %v3566_v8  ;;  %v1394_v35 = vld [vmem:[#allocation6 + $0x170] sm:$0xff]  ;;  %v2890_v48 = vpack.c.bf16 %v1392_v43, %v1388_v16 }
 0x39c   : > { %v2922_v53 = vpack.c.bf16 %v1394_v35, %v1390_v24  ;;  %v1640_v16 = vld [vmem:[#allocation9 + $0x250] sm:$0xff]  ;;  %v1651_v24 = vld [vmem:[#allocation9 + $0x2a8] sm:$0xff]  ;;  %v1649_v35 = vld [vmem:[#allocation9 + $0x298] sm:$0xff] }
 0x39d   : > { %2875 = vmatpush1.bf16.msra.mxu0 %v2874_v50  ;;  %2907 = vmatpush1.bf16.msra.mxu1 %v2906_v51  ;;  %v1396_v50 = vld [vmem:[#allocation6 + $0x180] sm:$0xff]  ;;  %v1644_v43 = vld [vmem:[#allocation9 + $0x270] sm:$0xff] }
 0x39e   : > { %2877 = vmatprep.subr.bf16.mxu0 %v2876_v62  ;;  %2909 = vmatprep.subr.bf16.mxu1 %v2908_v0  ;;  %v1400_v51 = vld [vmem:[#allocation6 + $0x1a0] sm:$0xff]  ;;  %v1398_v62 = vld [vmem:[#allocation6 + $0x190] sm:$0xff] }
 0x39f   : > { %v1402_v0 = vld [vmem:[#allocation6 + $0x1b0] sm:$0xff]  ;;  %v2894_v15 = vpack.c.bf16 %v1400_v51, %v1396_v50 }
 0x3a0   : > { %v2926_v19 = vpack.c.bf16 %v1402_v0, %v1398_v62  ;;  %v1648_v50 = vld [vmem:[#allocation9 + $0x290] sm:$0xff]  ;;  %v1659_v62 = vld [vmem:[#allocation9 + $0x2e8] sm:$0xff]  ;;  %v1657_v0 = vld [vmem:[#allocation9 + $0x2d8] sm:$0xff] }
 0x3a1   : > { %2879 = vmatpush1.bf16.msra.mxu0 %v2878_v25  ;;  %2911 = vmatpush1.bf16.msra.mxu1 %v2910_v27  ;;  %v1404_v25 = vld [vmem:[#allocation6 + $0x1c0] sm:$0xff]  ;;  %v2896_v27 = vpack.c.bf16 %v1409_v5, %v1405_v1  ;;  %v1652_v51 = vld [vmem:[#allocation9 + $0x2b0] sm:$0xff]  ;;  %v1661_v5 = vld [vmem:[#allocation9 + $0x2f8] sm:$0xff] }
 0x3a2   : > { %2881 = vmatprep.subr.bf16.mxu0 %v2880_v38  ;;  %2913 = vmatprep.subr.bf16.mxu1 %v2912_v40  ;;  %v1406_v38 = vld [vmem:[#allocation6 + $0x1d0] sm:$0xff]  ;;  %v2898_v41 = vpack.c.bf16 %v1408_v32, %v1404_v25  ;;  %v1663_v32 = vld [vmem:[#allocation9 + $0x308] sm:$0xff] }
 0x3a3   : > { %v1410_v40 = vld [vmem:[#allocation6 + $0x1f0] sm:$0xff] }
 0x3a4   : > { %v2930_v46 = vpack.c.bf16 %v1410_v40, %v1406_v38  ;;  %v1656_v25 = vld [vmem:[#allocation9 + $0x2d0] sm:$0xff]  ;;  %v1667_v38 = vld [vmem:[#allocation9 + $0x328] sm:$0xff]  ;;  %v1665_v40 = vld [vmem:[#allocation9 + $0x318] sm:$0xff] }
 0x3a5   : > { %2883 = vmatpush1.bf16.msra.mxu0 %v2882_v9  ;;  %2915 = vmatpush1.bf16.msra.mxu1 %v2914_v10  ;;  %v1630_v9 = vld [vmem:[#allocation9 + $0x200] sm:$0xff]  ;;  %v4177_v10 = vpack.c.bf16 %v1637_v63, %v1633_v57 }
 0x3a6   : > { %2885 = vmatprep.subr.bf16.mxu0 %v2884_v22  ;;  %2917 = vmatprep.subr.bf16.mxu1 %v2916_v37  ;;  %v1636_v22 = vld [vmem:[#allocation9 + $0x230] sm:$0xff]  ;;  %v1639_v37 = vld [vmem:[#allocation9 + $0x248] sm:$0xff] }
 0x3a7   : > { %v4187_v3 = vpack.c.bf16 %v1643_v61, %v1639_v37  ;;  %v1675_v37 = vld [vmem:[#allocation9 + $0x368] sm:$0xff]  ;;  %v1673_v61 = vld [vmem:[#allocation9 + $0x358] sm:$0xff] }
 0x3a9   : > { %2887 = vmatpush1.bf16.msra.mxu0 %v2886_v13  ;;  %2919 = vmatpush1.bf16.msra.mxu1 %v2918_v39  ;;  %v4189_v13 = vpack.c.bf16 %v1645_v4, %v1641_v2  ;;  %v4191_v39 = vpack.c.bf16 %v1642_v7, %v1638_v6  ;;  %v1677_v2 = vld [vmem:[#allocation9 + $0x378] sm:$0xff]  ;;  %v1670_v7 = vld [vmem:[#allocation9 + $0x340] sm:$0xff] }
 0x3aa   : > { %2889 = vmatprep.subr.bf16.mxu0 %v2888_v18  ;;  %2921 = vmatprep.subr.bf16.mxu1 %v2920_v20  ;;  %v4194_v18 = vpack.c.bf16 %v1644_v43, %v1640_v16  ;;  %v1647_v20 = vld [vmem:[#allocation9 + $0x288] sm:$0xff]  ;;  %v4236_v6 = vpack.c.bf16 %v1677_v2, %v1673_v61  ;;  %v1674_v16 = vld [vmem:[#allocation9 + $0x360] sm:$0xff]  ;;  %v1672_v43 = vld [vmem:[#allocation9 + $0x350] sm:$0xff] }
 0x3ab   : > { %v4199_v30 = vpack.c.bf16 %v1651_v24, %v1647_v20  ;;  %v4239_v20 = vpack.c.bf16 %v1674_v16, %v1670_v7  ;;  %v1676_v24 = vld [vmem:[#allocation9 + $0x370] sm:$0xff] }
 0x3ad   : > { %2891 = vmatpush1.bf16.msra.mxu0 %v2890_v48  ;;  %2923 = vmatpush1.bf16.msra.mxu1 %v2922_v53  ;;  %v4201_v48 = vpack.c.bf16 %v1653_v42, %v1649_v35  ;;  %v4203_v53 = vpack.c.bf16 %v1650_v47, %v1646_v44  ;;  %v1679_v35 = vld [vmem:[#allocation9 + $0x388] sm:$0xff]  ;;  %v4243_v44 = vpack.c.bf16 %v1676_v24, %v1672_v43 }
 0x3ae   : > { %2893 = vmatprep.subr.bf16.mxu0 %v2892_v52  ;;  %2925 = vmatprep.subr.bf16.mxu1 %v2924_v56  ;;  %v4206_v52 = vpack.c.bf16 %v1652_v51, %v1648_v50  ;;  %v1655_v56 = vld [vmem:[#allocation9 + $0x2c8] sm:$0xff]  ;;  %v1681_v50 = vld [vmem:[#allocation9 + $0x398] sm:$0xff] }
 0x3af   : > { %v4211_v1 = vpack.c.bf16 %v1659_v62, %v1655_v56  ;;  %v1683_v42 = vld [vmem:[#allocation9 + $0x3a8] sm:$0xff]  ;;  %v1685_v51 = vld [vmem:[#allocation9 + $0x3b8] sm:$0xff]  ;;  %v1678_v56 = vld [vmem:[#allocation9 + $0x380] sm:$0xff] }
 0x3b0   : > { %v4245_v47 = vpack.c.bf16 %v1683_v42, %v1679_v35  ;;  %v4247_v62 = vpack.c.bf16 %v1685_v51, %v1681_v50 }
 0x3b1   : > { %2895 = vmatpush1.bf16.msra.mxu0 %v2894_v15  ;;  %2927 = vmatpush1.bf16.msra.mxu1 %v2926_v19  ;;  %v4213_v15 = vpack.c.bf16 %v1661_v5, %v1657_v0  ;;  %v4215_v19 = vpack.c.bf16 %v1658_v14, %v1654_v12  ;;  %v1682_v0 = vld [vmem:[#allocation9 + $0x3a0] sm:$0xff]  ;;  %v1680_v5 = vld [vmem:[#allocation9 + $0x390] sm:$0xff] }
 0x3b2   : > { %2897 = vmatprep.subr.bf16.mxu0 %v2896_v27  ;;  %2929 = vmatprep.subr.bf16.mxu1 %v2928_v28  ;;  %v1660_v27 = vld [vmem:[#allocation9 + $0x2f0] sm:$0xff]  ;;  %v4250_v14 = vpack.c.bf16 %v1682_v0, %v1678_v56 }
 0x3b3   : > { %v4218_v28 = vpack.c.bf16 %v1660_v27, %v1656_v25  ;;  %v1684_v12 = vld [vmem:[#allocation9 + $0x3b0] sm:$0xff]  ;;  %v1687_v27 = vld [vmem:[#allocation9 + $0x3c8] sm:$0xff] }
 0x3b4   : > { %v4254_v25 = vpack.c.bf16 %v1684_v12, %v1680_v5 }
 0x3b5   : > { %2899 = vmatpush1.bf16.msra.mxu0 %v2898_v41  ;;  %2931 = vmatpush1.bf16.msra.mxu1 %v2930_v46  ;;  %v4223_v41 = vpack.c.bf16 %v1667_v38, %v1663_v32  ;;  %v1669_v46 = vld [vmem:[#allocation9 + $0x338] sm:$0xff]  ;;  %v1691_v32 = vld [vmem:[#allocation9 + $0x3e8] sm:$0xff] }
 0x3b6   : > { %2965 = vmatprep.subr.bf16.mxu1 %v4177_v10  ;;  %v4225_v57 = vpack.c.bf16 %v1669_v46, %v1665_v40  ;;  %v1689_v38 = vld [vmem:[#allocation9 + $0x3d8] sm:$0xff]  ;;  %v4259_v40 = vpack.c.bf16 %v1691_v32, %v1687_v27 }
 0x3b7   : > { %v1693_v46 = vld [vmem:[#allocation9 + $0x3f8] sm:$0xff] }
 0x3b8   : > { %1500 = vmatmul.mubr.f32.vlgmr.msra.gmra.mrb[8].mxu0 %v4067_v45  ;;  %1589 = vmatmul.mubr.f32.vlgmr.msra.gmra.mrb[8].mxu1 %v4067_v45  ;;  %v1631_v45 = vld [vmem:[#allocation9 + $0x208] sm:$0xff] }
 0x3b9   : > { %1505 = vmatprep.mubr.f32.mxu0 %v3566_v8  ;;  %1594 = vmatprep.mubr.f32.mxu1 %v3566_v8  ;;  %v4175_v58 = vpack.c.bf16 %v1635_v55, %v1631_v45  ;;  %v1662_v45 = vld [vmem:[#allocation9 + $0x300] sm:$0xff] }
 0x3ba   : > { %v1666_v55 = vld [vmem:[#allocation9 + $0x320] sm:$0xff] }
 0x3bb   : > { %2933 = vmatprep.subr.bf16.mxu0 %v4175_v58  ;;  %v4227_v63 = vpack.c.bf16 %v1666_v55, %v1662_v45  ;;  %v1686_v45 = vld [vmem:[#allocation9 + $0x3c0] sm:$0xff] }
 0x3bc   : > { %1506 = vmatmul.mubr.f32.gmra.mrb[10].mxu0 %v4113_v59  ;;  %1595 = vmatmul.mubr.f32.gmra.mrb[10].mxu1 %v4113_v59  ;;  %v1634_v59 = vld [vmem:[#allocation9 + $0x220] sm:$0xff] }
 0x3bd   : > { %1511 = vmatprep.mubr.f32.mxu0 %v3566_v8  ;;  %1600 = vmatprep.mubr.f32.mxu1 %v3566_v8  ;;  %v4179_v11 = vpack.c.bf16 %v1634_v59, %v1630_v9  ;;  %v1664_v9 = vld [vmem:[#allocation9 + $0x310] sm:$0xff]  ;;  %v1690_v55 = vld [vmem:[#allocation9 + $0x3e0] sm:$0xff] }
 0x3be   : > { %v1668_v59 = vld [vmem:[#allocation9 + $0x330] sm:$0xff] }
 0x3bf   : > { %2935 = vmatpush1.bf16.msra.mxu0 %v4179_v11 }
 0x3c0   : > { %1512 = vmatmul.mubr.f32.gmra.mrb[12].mxu0 %v4157_v23  ;;  %1601 = vmatmul.mubr.f32.gmra.mrb[12].mxu1 %v4157_v23  ;;  %v4182_v23 = vpack.c.bf16 %v1636_v22, %v1632_v17  ;;  %v1671_v17 = vld [vmem:[#allocation9 + $0x348] sm:$0xff]  ;;  %v4230_v22 = vpack.c.bf16 %v1668_v59, %v1664_v9  ;;  %v4261_v9 = vpack.c.bf16 %v1693_v46, %v1689_v38 }
 0x3c1   : > { %1517 = vmatprep.mubr.f32.mxu0 %v3566_v8  ;;  %1606 = vmatprep.mubr.f32.mxu1 %v3566_v8  ;;  %v4234_v4 = vpack.c.bf16 %v1675_v37, %v1671_v17  ;;  %v4263_v59 = vpack.c.bf16 %v1690_v55, %v1686_v45  ;;  %v1688_v17 = vld [vmem:[#allocation9 + $0x3d0] sm:$0xff] }
 0x3c2   : > { %2967 = vmatpush1.bf16.msra.mxu1 %v4182_v23  ;;  %2937 = vmatprep.subr.bf16.mxu0 %v4187_v3  ;;  %v1692_v37 = vld [vmem:[#allocation9 + $0x3f0] sm:$0xff] }
 0x3c3   : > { %2969 = vmatprep.subr.bf16.mxu1 %v4189_v13  ;;  %2939 = vmatpush1.bf16.msra.mxu0 %v4191_v39  ;;  %v4266_v61 = vpack.c.bf16 %v1692_v37, %v1688_v17 }
 0x3c4   : > { %2941 = vmatprep.subr.bf16.mxu0 %v4199_v30 }
 0x3c6   : > { %2971 = vmatpush1.bf16.msra.mxu1 %v4194_v18 }
 0x3c7   : > { %2973 = vmatprep.subr.bf16.mxu1 %v4201_v48  ;;  %2943 = vmatpush1.bf16.msra.mxu0 %v4203_v53 }
 0x3c8   : > { %2945 = vmatprep.subr.bf16.mxu0 %v4211_v1 }
 0x3ca   : > { %2975 = vmatpush1.bf16.msra.mxu1 %v4206_v52 }
 0x3cb   : > { %2977 = vmatprep.subr.bf16.mxu1 %v4213_v15  ;;  %2947 = vmatpush1.bf16.msra.mxu0 %v4215_v19 }
 0x3cc   : > { %2949 = vmatprep.subr.bf16.mxu0 %v4223_v41 }
 0x3ce   : > { %2979 = vmatpush1.bf16.msra.mxu1 %v4218_v28 }
 0x3cf   : > { %2981 = vmatprep.subr.bf16.mxu1 %v4225_v57  ;;  %2951 = vmatpush1.bf16.msra.mxu0 %v4227_v63 }
 0x3d0   : > { %2953 = vmatprep.subr.bf16.mxu0 %v4234_v4 }
 0x3d2   : > { %2983 = vmatpush1.bf16.msra.mxu1 %v4230_v22 }
 0x3d3   : > { %2985 = vmatprep.subr.bf16.mxu1 %v4236_v6  ;;  %2955 = vmatpush1.bf16.msra.mxu0 %v4239_v20 }
 0x3d4   : > { %2957 = vmatprep.subr.bf16.mxu0 %v4245_v47 }
 0x3d6   : > { %2987 = vmatpush1.bf16.msra.mxu1 %v4243_v44 }
 0x3d7   : > { %2989 = vmatprep.subr.bf16.mxu1 %v4247_v62  ;;  %2959 = vmatpush1.bf16.msra.mxu0 %v4250_v14 }
 0x3d8   : > { %2961 = vmatprep.subr.bf16.mxu0 %v4259_v40 }
 0x3da   : > { %2991 = vmatpush1.bf16.msra.mxu1 %v4254_v25 }
 0x3db   : > { %2993 = vmatprep.subr.bf16.mxu1 %v4261_v9  ;;  %2963 = vmatpush1.bf16.msra.mxu0 %v4263_v59 }
 0x3dc   : > { %2997 = vmatprep.subr.bf16.mxu0 %v4175_v58 }
 0x3de   : > { %2995 = vmatpush1.bf16.msra.mxu1 %v4266_v61 }
 0x3df   : > { %3029 = vmatprep.subr.bf16.mxu1 %v4177_v10 }
 0x46b   : > { %v1236_v2 = vpop.f32.mrb[6].mxu0  ;;  %v1307_v7 = vpop.f32.mrb[6].mxu1 }
 0x46c   : > { %v3194_v16 = vadd.f32 %v1236_v2, %v4044_v33  ;;  %v1238_v43 = vpop.f32.mrb[7].mxu0  ;;  %v1309_v24 = vpop.f32.mrb[7].mxu1  ;;  %v3202_v51 = vadd.f32 %v1307_v7, %v4055_v49  ;;  %v1695_v7 = vld [vmem:[#allocation4 + $0x8] sm:$0xff] }
 0x46d   : > { %v3195_v35 = vadd.f32 %v1238_v43, %v4048_v34  ;;  %v3203_v56 = vadd.f32 %v1309_v24, %v4061_v60 }
 0x46e   : > { %v2525_v42 = vmul.f32 -1.442695, %v3194_v16  ;;  %v2527_v0 = vmul.f32 -1.442695, %v3202_v51 }
 0x46f   : > { %v2526_v50 = vmul.f32 -1.442695, %v3195_v35 }
 0x470   : > { %3349 = vpow2.f32 %v2525_v42 }
 0x471   : > { %3351 = vpow2.f32 %v2526_v50 }
 0x472   : > { %3353 = vtanh.f32 %v3203_v56 }
 0x473   : > { %3355 = vpow2.f32 %v2527_v0 }
 0x47a   : > { %v3350_v5 = vpop.eup %3349 }
 0x47b   : > { %v1325_v12 = vadd.f32 1.0, %v3350_v5  ;;  %v3352_v27 = vpop.eup %3351 }
 0x47c   : > { %v1326_v33 = vadd.f32 1.0, %v3352_v27  ;;  %v3354_v32 = vpop.eup %3353 }
 0x47d   : > { %3357 = vrcp.f32 %v1325_v12  ;;  %v3356_v38 = vpop.eup %3355 }
 0x47e   : > { %3359 = vrcp.f32 %v1326_v33  ;;  %v1327_v55 = vadd.f32 1.0, %v3356_v38 }
 0x480   : > { %3361 = vrcp.f32 %v1327_v55 }
 0x487   : > { %v3358_v34 = vpop.eup %3357 }
 0x488   : > { %v1336_v46 = vmul.f32 %v3358_v34, %v3354_v32  ;;  %v3360_v45 = vpop.eup %3359 }
 0x489   : > { %v1335_v17 = vmul.f32 %v3360_v45, %v4154_v21  ;;  %v2528_v21 = vld [vmem:[%s4476_s4 + $0x4] sm:$0xf] }
 0x48a   : > { %v3362_v60 = vpop.eup %3361  ;;  %v4319_v16 = vrot.slane %v2528_v21, %v349_v29  ;;  %v4323_v43 = vrot.slane %v2528_v21, %v353_v31  ;;  %v4329_v12 = vrot.slane %v2528_v21, %v357_v36  ;;  %v4333_v29 = vrot.slane %v2528_v21, %v361_v54 }
 0x48b   : > { %v1337_v49 = vadd.f32 %v1336_v46, %v1335_v17  ;;  %v1697_v17 = vld [vmem:[#allocation5 + $0x8] sm:$0xff] }
 0x48d   : > { %1343 = vst [vmem:[#allocation5] sm:$0xff] %v1337_v49  ;;  %3363 = vtanh.f32 %v1337_v49 }
 0x497   : > { %v3364_v37 = vpop.eup %3363 }
 0x498   : > { %v1339_v2 = vmul.f32 %v3364_v37, %v3362_v60 }
 0x49a   : > { %1342 = vst [vmem:[#allocation4] sm:$0xff] %v1339_v2  ;;  %1518 = vmatmul.mubr.f32.gmra.mrb[14].mxu0 %v1339_v2  ;;  %1607 = vmatmul.mubr.f32.gmra.mrb[14].mxu1 %v1339_v2 }
 0x49b   : > { %1766 = vmatprep.mubr.f32.mxu0 %v3566_v8  ;;  %1837 = vmatprep.mubr.f32.mxu1 %v3566_v8 }
 0x49e   : > { %1767 = vmatmul.mubr.f32.vlgmr.msra.gmra.mrb[8].mxu0 %v1695_v7  ;;  %1838 = vmatmul.mubr.f32.vlgmr.msra.gmra.mrb[8].mxu1 %v1695_v7 }
 0x49f   : > { %2999 = vmatpush1.bf16.msra.mxu0 %v4179_v11  ;;  %3031 = vmatpush1.bf16.msra.mxu1 %v4182_v23 }
 0x4a0   : > { %3001 = vmatprep.subr.bf16.mxu0 %v4187_v3  ;;  %3033 = vmatprep.subr.bf16.mxu1 %v4189_v13 }
 0x4a1   : > { %1940 = vmatprep.mubr.f32.mxu0 %v3566_v8  ;;  %2011 = vmatprep.mubr.f32.mxu1 %v3566_v8 }
 0x4a3   : > { %3003 = vmatpush1.bf16.msra.mxu0 %v4191_v39  ;;  %3035 = vmatpush1.bf16.msra.mxu1 %v4194_v18 }
 0x4a4   : > { %3005 = vmatprep.subr.bf16.mxu0 %v4199_v30  ;;  %3037 = vmatprep.subr.bf16.mxu1 %v4201_v48 }
 0x4a7   : > { %3007 = vmatpush1.bf16.msra.mxu0 %v4203_v53  ;;  %3039 = vmatpush1.bf16.msra.mxu1 %v4206_v52 }
 0x4a8   : > { %3009 = vmatprep.subr.bf16.mxu0 %v4211_v1  ;;  %3041 = vmatprep.subr.bf16.mxu1 %v4213_v15 }
 0x4ab   : > { %3011 = vmatpush1.bf16.msra.mxu0 %v4215_v19  ;;  %3043 = vmatpush1.bf16.msra.mxu1 %v4218_v28 }
 0x4ac   : > { %3013 = vmatprep.subr.bf16.mxu0 %v4223_v41  ;;  %3045 = vmatprep.subr.bf16.mxu1 %v4225_v57 }
 0x4af   : > { %3015 = vmatpush1.bf16.msra.mxu0 %v4227_v63  ;;  %3047 = vmatpush1.bf16.msra.mxu1 %v4230_v22 }
 0x4b0   : > { %3017 = vmatprep.subr.bf16.mxu0 %v4234_v4  ;;  %3049 = vmatprep.subr.bf16.mxu1 %v4236_v6 }
 0x4b3   : > { %3019 = vmatpush1.bf16.msra.mxu0 %v4239_v20  ;;  %3051 = vmatpush1.bf16.msra.mxu1 %v4243_v44 }
 0x4b4   : > { %3021 = vmatprep.subr.bf16.mxu0 %v4245_v47  ;;  %3053 = vmatprep.subr.bf16.mxu1 %v4247_v62 }
 0x4b7   : > { %3023 = vmatpush1.bf16.msra.mxu0 %v4250_v14  ;;  %3055 = vmatpush1.bf16.msra.mxu1 %v4254_v25 }
 0x4b8   : > { %3025 = vmatprep.subr.bf16.mxu0 %v4259_v40  ;;  %3057 = vmatprep.subr.bf16.mxu1 %v4261_v9 }
 0x4bb   : > { %3027 = vmatpush1.bf16.msra.mxu0 %v4263_v59  ;;  %3059 = vmatpush1.bf16.msra.mxu1 %v4266_v61 }
 0x4bc   : > { %3061 = vmatprep.subr.bf16.mxu0 %v4175_v58  ;;  %3093 = vmatprep.subr.bf16.mxu1 %v4177_v10 }
 0x571   : > { %v1768_v24 = vpop.f32.mrb[8].mxu0  ;;  %v1839_v35 = vpop.f32.mrb[8].mxu1 }
 0x572   : > { %v3204_v42 = vadd.f32 %v1768_v24, %v4319_v16  ;;  %v1770_v50 = vpop.f32.mrb[9].mxu0  ;;  %v1841_v51 = vpop.f32.mrb[9].mxu1  ;;  %v3212_v31 = vadd.f32 %v1839_v35, %v4329_v12 }
 0x573   : > { %v3205_v56 = vadd.f32 %v1770_v50, %v4323_v43  ;;  %v3213_v27 = vadd.f32 %v1841_v51, %v4333_v29 }
 0x574   : > { %v2529_v0 = vmul.f32 -1.442695, %v3204_v42  ;;  %v2531_v33 = vmul.f32 -1.442695, %v3212_v31 }
 0x575   : > { %v2530_v5 = vmul.f32 -1.442695, %v3205_v56 }
 0x576   : > { %3365 = vpow2.f32 %v2529_v0 }
 0x577   : > { %3367 = vpow2.f32 %v2530_v5 }
 0x578   : > { %3369 = vtanh.f32 %v3213_v27 }
 0x579   : > { %3371 = vpow2.f32 %v2531_v33 }
 0x580   : > { %v3366_v32 = vpop.eup %3365 }
 0x581   : > { %v1857_v38 = vadd.f32 1.0, %v3366_v32  ;;  %v3368_v34 = vpop.eup %3367 }
 0x582   : > { %v1858_v46 = vadd.f32 1.0, %v3368_v34  ;;  %v3370_v36 = vpop.eup %3369 }
 0x583   : > { %3373 = vrcp.f32 %v1857_v38  ;;  %v3372_v45 = vpop.eup %3371 }
 0x584   : > { %3375 = vrcp.f32 %v1858_v46  ;;  %v1859_v49 = vadd.f32 1.0, %v3372_v45 }
 0x586   : > { %3377 = vrcp.f32 %v1859_v49 }
 0x58d   : > { %v3374_v55 = vpop.eup %3373 }
 0x58e   : > { %v1868_v26 = vmul.f32 %v3374_v55, %v3370_v36  ;;  %v3376_v54 = vpop.eup %3375 }
 0x58f   : > { %v1867_v60 = vmul.f32 %v3376_v54, %v1697_v17 }
 0x590   : > { %v3378_v2 = vpop.eup %3377 }
 0x591   : > { %v4337_v37 = vadd.f32 %v1868_v26, %v1867_v60 }
 0x593   : > { %3379 = vtanh.f32 %v4337_v37 }
 0x59d   : > { %v3380_v7 = vpop.eup %3379 }
 0x59e   : > { %v1871_v21 = vmul.f32 %v3380_v7, %v3378_v2 }
 0x5a0   : > { %1941 = vmatmul.mubr.f32.vlgmr.msra.gmra.mrb[10].mxu0 %v1871_v21  ;;  %2012 = vmatmul.mubr.f32.vlgmr.msra.gmra.mrb[10].mxu1 %v1871_v21 }
 0x5a1   : > { %3063 = vmatpush1.bf16.msra.mxu0 %v4179_v11  ;;  %3095 = vmatpush1.bf16.msra.mxu1 %v4182_v23 }
 0x5a2   : > { %3065 = vmatprep.subr.bf16.mxu0 %v4187_v3  ;;  %3097 = vmatprep.subr.bf16.mxu1 %v4189_v13 }
 0x5a3   : > { %2114 = vmatprep.mubr.f32.mxu0 %v3566_v8  ;;  %2185 = vmatprep.mubr.f32.mxu1 %v3566_v8 }
 0x5a5   : > { %3067 = vmatpush1.bf16.msra.mxu0 %v4191_v39  ;;  %3099 = vmatpush1.bf16.msra.mxu1 %v4194_v18 }
 0x5a6   : > { %3069 = vmatprep.subr.bf16.mxu0 %v4199_v30  ;;  %3101 = vmatprep.subr.bf16.mxu1 %v4201_v48 }
 0x5a9   : > { %3071 = vmatpush1.bf16.msra.mxu0 %v4203_v53  ;;  %3103 = vmatpush1.bf16.msra.mxu1 %v4206_v52 }
 0x5aa   : > { %3073 = vmatprep.subr.bf16.mxu0 %v4211_v1  ;;  %3105 = vmatprep.subr.bf16.mxu1 %v4213_v15 }
 0x5ad   : > { %3075 = vmatpush1.bf16.msra.mxu0 %v4215_v19  ;;  %3107 = vmatpush1.bf16.msra.mxu1 %v4218_v28 }
 0x5ae   : > { %3077 = vmatprep.subr.bf16.mxu0 %v4223_v41  ;;  %3109 = vmatprep.subr.bf16.mxu1 %v4225_v57 }
 0x5b1   : > { %3079 = vmatpush1.bf16.msra.mxu0 %v4227_v63  ;;  %3111 = vmatpush1.bf16.msra.mxu1 %v4230_v22 }
 0x5b2   : > { %3081 = vmatprep.subr.bf16.mxu0 %v4234_v4  ;;  %3113 = vmatprep.subr.bf16.mxu1 %v4236_v6 }
 0x5b5   : > { %3083 = vmatpush1.bf16.msra.mxu0 %v4239_v20  ;;  %3115 = vmatpush1.bf16.msra.mxu1 %v4243_v44 }
 0x5b6   : > { %3085 = vmatprep.subr.bf16.mxu0 %v4245_v47  ;;  %3117 = vmatprep.subr.bf16.mxu1 %v4247_v62 }
 0x5b9   : > { %3087 = vmatpush1.bf16.msra.mxu0 %v4250_v14  ;;  %3119 = vmatpush1.bf16.msra.mxu1 %v4254_v25 }
 0x5ba   : > { %3089 = vmatprep.subr.bf16.mxu0 %v4259_v40  ;;  %3121 = vmatprep.subr.bf16.mxu1 %v4261_v9 }
 0x5bd   : > { %3091 = vmatpush1.bf16.msra.mxu0 %v4263_v59  ;;  %3123 = vmatpush1.bf16.msra.mxu1 %v4266_v61 }
 0x5be   : > { %3125 = vmatprep.subr.bf16.mxu0 %v4175_v58  ;;  %3157 = vmatprep.subr.bf16.mxu1 %v4177_v10 }
 0x673   : > { %v1942_v24 = vpop.f32.mrb[10].mxu0  ;;  %v2013_v35 = vpop.f32.mrb[10].mxu1 }
 0x674   : > { %v3206_v42 = vadd.f32 %v1942_v24, %v4319_v16  ;;  %v1944_v50 = vpop.f32.mrb[11].mxu0  ;;  %v2015_v51 = vpop.f32.mrb[11].mxu1  ;;  %v3214_v31 = vadd.f32 %v2013_v35, %v4329_v12 }
 0x675   : > { %v3207_v56 = vadd.f32 %v1944_v50, %v4323_v43  ;;  %v3215_v27 = vadd.f32 %v2015_v51, %v4333_v29 }
 0x676   : > { %v2532_v0 = vmul.f32 -1.442695, %v3206_v42  ;;  %v2534_v33 = vmul.f32 -1.442695, %v3214_v31 }
 0x677   : > { %v2533_v5 = vmul.f32 -1.442695, %v3207_v56 }
 0x678   : > { %3381 = vpow2.f32 %v2532_v0 }
 0x679   : > { %3383 = vpow2.f32 %v2533_v5 }
 0x67a   : > { %3385 = vtanh.f32 %v3215_v27 }
 0x67b   : > { %3387 = vpow2.f32 %v2534_v33 }
 0x682   : > { %v3382_v58 = vpop.eup %3381 }
 0x683   : > { %v2031_v32 = vadd.f32 1.0, %v3382_v58  ;;  %v3384_v10 = vpop.eup %3383 }
 0x684   : > { %v2032_v38 = vadd.f32 1.0, %v3384_v10  ;;  %v3386_v34 = vpop.eup %3385 }
 0x685   : > { %3389 = vrcp.f32 %v2031_v32  ;;  %v3388_v46 = vpop.eup %3387 }
 0x686   : > { %3391 = vrcp.f32 %v2032_v38  ;;  %v2033_v17 = vadd.f32 1.0, %v3388_v46  ;;  %v2400_v38 = vld [vmem:[#allocation4] sm:$0xff] (!%p2541_p10)  ;;  %v2404_v46 = vld [vmem:[#allocation5] sm:$0xff] (!%p2541_p10) }
 0x687   : > { %2402 = vst [vmem:[#allocation11] sm:$0xff] (!%p2541_p10), %v2400_v38  ;;  %2406 = vst [vmem:[#allocation12] sm:$0xff] (!%p2541_p10), %v2404_v46 }
 0x688   : > { %3393 = vrcp.f32 %v2033_v17 }
 0x68f   : > { %v3390_v36 = vpop.eup %3389 }
 0x690   : > { %v2042_v45 = vmul.f32 %v3390_v36, %v3386_v34  ;;  %v3392_v55 = vpop.eup %3391 }
 0x691   : > { %v2041_v26 = vmul.f32 %v3392_v55, %v4337_v37 }
 0x692   : > { %v3394_v49 = vpop.eup %3393 }
 0x693   : > { %v4379_v54 = vadd.f32 %v2042_v45, %v2041_v26 }
 0x695   : > { %3395 = vtanh.f32 %v4379_v54 }
 0x69f   : > { %v3396_v60 = vpop.eup %3395 }
 0x6a0   : > { %v2045_v2 = vmul.f32 %v3396_v60, %v3394_v49 }
 0x6a2   : > { %2115 = vmatmul.mubr.f32.vlgmr.msra.gmra.mrb[12].mxu0 %v2045_v2  ;;  %2186 = vmatmul.mubr.f32.vlgmr.msra.gmra.mrb[12].mxu1 %v2045_v2 }
 0x6a3   : > { %3127 = vmatpush1.bf16.msra.mxu0 %v4179_v11  ;;  %3159 = vmatpush1.bf16.msra.mxu1 %v4182_v23 }
 0x6a4   : > { %3129 = vmatprep.subr.bf16.mxu0 %v4187_v3  ;;  %3161 = vmatprep.subr.bf16.mxu1 %v4189_v13 }
 0x6a5   : > { %2288 = vmatprep.mubr.f32.mxu0 %v3566_v8  ;;  %2359 = vmatprep.mubr.f32.mxu1 %v3566_v8 }
 0x6a7   : > { %3131 = vmatpush1.bf16.msra.mxu0 %v4191_v39  ;;  %3163 = vmatpush1.bf16.msra.mxu1 %v4194_v18 }
 0x6a8   : > { %3133 = vmatprep.subr.bf16.mxu0 %v4199_v30  ;;  %3165 = vmatprep.subr.bf16.mxu1 %v4201_v48 }
 0x6ab   : > { %3135 = vmatpush1.bf16.msra.mxu0 %v4203_v53  ;;  %3167 = vmatpush1.bf16.msra.mxu1 %v4206_v52 }
 0x6ac   : > { %3137 = vmatprep.subr.bf16.mxu0 %v4211_v1  ;;  %3169 = vmatprep.subr.bf16.mxu1 %v4213_v15 }
 0x6af   : > { %3139 = vmatpush1.bf16.msra.mxu0 %v4215_v19  ;;  %3171 = vmatpush1.bf16.msra.mxu1 %v4218_v28 }
 0x6b0   : > { %3141 = vmatprep.subr.bf16.mxu0 %v4223_v41  ;;  %3173 = vmatprep.subr.bf16.mxu1 %v4225_v57 }
 0x6b3   : > { %3143 = vmatpush1.bf16.msra.mxu0 %v4227_v63  ;;  %3175 = vmatpush1.bf16.msra.mxu1 %v4230_v22 }
 0x6b4   : > { %3145 = vmatprep.subr.bf16.mxu0 %v4234_v4  ;;  %3177 = vmatprep.subr.bf16.mxu1 %v4236_v6 }
 0x6b7   : > { %3147 = vmatpush1.bf16.msra.mxu0 %v4239_v20  ;;  %3179 = vmatpush1.bf16.msra.mxu1 %v4243_v44 }
 0x6b8   : > { %3149 = vmatprep.subr.bf16.mxu0 %v4245_v47  ;;  %3181 = vmatprep.subr.bf16.mxu1 %v4247_v62 }
 0x6bb   : > { %3151 = vmatpush1.bf16.msra.mxu0 %v4250_v14  ;;  %3183 = vmatpush1.bf16.msra.mxu1 %v4254_v25 }
 0x6bc   : > { %3153 = vmatprep.subr.bf16.mxu0 %v4259_v40  ;;  %3185 = vmatprep.subr.bf16.mxu1 %v4261_v9 }
 0x6bf   : > { %3155 = vmatpush1.bf16.msra.mxu0 %v4263_v59  ;;  %3187 = vmatpush1.bf16.msra.mxu1 %v4266_v61 }
 0x775   : > { %v2116_v8 = vpop.f32.mrb[12].mxu0  ;;  %v2187_v11 = vpop.f32.mrb[12].mxu1 }
 0x776   : > { %v3208_v23 = vadd.f32 %v2116_v8, %v4319_v16  ;;  %v2118_v3 = vpop.f32.mrb[13].mxu0  ;;  %v2189_v13 = vpop.f32.mrb[13].mxu1  ;;  %v3216_v48 = vadd.f32 %v2187_v11, %v4329_v12 }
 0x777   : > { %v3209_v39 = vadd.f32 %v2118_v3, %v4323_v43  ;;  %v3217_v53 = vadd.f32 %v2189_v13, %v4333_v29 }
 0x778   : > { %v2535_v18 = vmul.f32 -1.442695, %v3208_v23  ;;  %v2537_v52 = vmul.f32 -1.442695, %v3216_v48 }
 0x779   : > { %v2536_v30 = vmul.f32 -1.442695, %v3209_v39 }
 0x77a   : > { %3397 = vpow2.f32 %v2535_v18 }
 0x77b   : > { %3399 = vpow2.f32 %v2536_v30 }
 0x77c   : > { %3401 = vtanh.f32 %v3217_v53 }
 0x77d   : > { %3403 = vpow2.f32 %v2537_v52 }
 0x784   : > { %v3398_v1 = vpop.eup %3397 }
 0x785   : > { %v2205_v15 = vadd.f32 1.0, %v3398_v1  ;;  %v3400_v19 = vpop.eup %3399 }
 0x786   : > { %v2206_v28 = vadd.f32 1.0, %v3400_v19  ;;  %v3402_v41 = vpop.eup %3401 }
 0x787   : > { %3405 = vrcp.f32 %v2205_v15  ;;  %v3404_v57 = vpop.eup %3403 }
 0x788   : > { %3407 = vrcp.f32 %v2206_v28  ;;  %v2207_v6 = vadd.f32 1.0, %v3404_v57 }
 0x78a   : > { %3409 = vrcp.f32 %v2207_v6 }
 0x791   : > { %v3406_v63 = vpop.eup %3405 }
 0x792   : > { %v2216_v22 = vmul.f32 %v3406_v63, %v3402_v41  ;;  %v3408_v4 = vpop.eup %3407 }
 0x793   : > { %v2215_v20 = vmul.f32 %v3408_v4, %v4379_v54 }
 0x794   : > { %v3410_v47 = vpop.eup %3409 }
 0x795   : > { %v2217_v44 = vadd.f32 %v2216_v22, %v2215_v20 }
 0x797   : > { %3411 = vtanh.f32 %v2217_v44 }
 0x7a1   : > { %v3412_v62 = vpop.eup %3411 }
 0x7a2   : > { %v2219_v14 = vmul.f32 %v3412_v62, %v3410_v47 }
 0x7a4   : > { %2289 = vmatmul.mubr.f32.vlgmr.msra.gmra.mrb[14].mxu0 %v2219_v14  ;;  %2360 = vmatmul.mubr.f32.vlgmr.msra.gmra.mrb[14].mxu1 %v2219_v14 }
 0x877   : > { %v2290_v25 = vpop.f32.mrb[14].mxu0  ;;  %v2361_v40 = vpop.f32.mrb[14].mxu1 }
 0x878   : > { %v3210_v9 = vadd.f32 %v2290_v25, %v4319_v16  ;;  %v2292_v59 = vpop.f32.mrb[15].mxu0  ;;  %v2363_v61 = vpop.f32.mrb[15].mxu1  ;;  %v3218_v24 = vadd.f32 %v2361_v40, %v4329_v12 }
 0x879   : > { %v3211_v37 = vadd.f32 %v2292_v59, %v4323_v43  ;;  %v3219_v35 = vadd.f32 %v2363_v61, %v4333_v29 }
 0x87a   : > { %v2538_v7 = vmul.f32 -1.442695, %v3210_v9  ;;  %v2540_v42 = vmul.f32 -1.442695, %v3218_v24 }
 0x87b   : > { %v2539_v21 = vmul.f32 -1.442695, %v3211_v37 }
 0x87c   : > { %3413 = vpow2.f32 %v2538_v7 }
 0x87d   : > { %3415 = vpow2.f32 %v2539_v21 }
 0x87e   : > { %3417 = vtanh.f32 %v3219_v35 }
 0x87f   : > { %3419 = vpow2.f32 %v2540_v42 }
 0x886   : > { %v3414_v50 = vpop.eup %3413 }
 0x887   : > { %v2379_v51 = vadd.f32 1.0, %v3414_v50  ;;  %v3416_v56 = vpop.eup %3415 }
 0x888   : > { %v2380_v16 = vadd.f32 1.0, %v3416_v56  ;;  %v3418_v0 = vpop.eup %3417 }
 0x889   : > { %3421 = vrcp.f32 %v2379_v51  ;;  %v3420_v5 = vpop.eup %3419 }
 0x88a   : > { %3423 = vrcp.f32 %v2380_v16  ;;  %v2381_v33 = vadd.f32 1.0, %v3420_v5 }
 0x88c   : > { %3425 = vrcp.f32 %v2381_v33 }
 0x893   : > { %v3422_v43 = vpop.eup %3421 }
 0x894   : > { %v2390_v31 = vmul.f32 %v3422_v43, %v3418_v0  ;;  %v3424_v27 = vpop.eup %3423 }
 0x895   : > { %v2389_v58 = vmul.f32 %v3424_v27, %v2217_v44 }
 0x896   : > { %v3426_v12 = vpop.eup %3425 }
 0x897   : > { %v2391_v32 = vadd.f32 %v2390_v31, %v2389_v58 }
 0x899   : > { %3427 = vtanh.f32 %v2391_v32  ;;  %2395 = vst [vmem:[#allocation5 + $0x8] sm:$0xff] %v2391_v32 }
 0x8a0   : > { %2399 = sbr.rel (%p2541_p10) target bundleno = 2223 (0x8af), region = 56  ;;  %v2405_v36 = vld [vmem:[#allocation5 + $0x8] sm:$0xff] (!%p2541_p10) }
 0x8a1   : > { %2407 = vst [vmem:[#allocation12 + $0x8] sm:$0xff] (!%p2541_p10), %v2405_v36 }
 0x8a3   : > { %v3428_v29 = vpop.eup %3427 }
 0x8a4   : > { %v2393_v10 = vmul.f32 %v3428_v29, %v3426_v12 }
 0x8a6   : > { %2394 = vst [vmem:[#allocation4 + $0x8] sm:$0xff] %v2393_v10 }
 0x8ad   : > { %v2401_v34 = vld [vmem:[#allocation4 + $0x8] sm:$0xff] }
 0x8ae   : > { %2403 = vst [vmem:[#allocation11 + $0x8] sm:$0xff] %v2401_v34 }
 0x8af PF: > { %p3279_p11 = scmp.eq.s32.totalorder %s3612_s22, 1  ;;  %s3567_s15 = smov [#allocation11]  }
 0x8b0   : > { %s2414_s16 = sshll.u32 %s3567_s15, 4  ;;  %s2415_s16 = int_to_ptr.vmem [resolvable:$true] %s2414_s16 }
 0x8b1   : > { %s3485_s17 = scalar_lea.vmem %s2415_s16, 256  ;;  %p3492_p1 = scmp.lt.s32.totalorder %s2415_s16, %s2415_s16 }
 0x8b2   : > { %p3486_p12 = scmp.ne.s32.totalorder %s2415_s16, %s3485_s17  ;;  %p3493_p5 = scmp.lt.s32.totalorder %s3485_s17, %s3485_s17 }
 0x8b4   : > { %p3487_p13 = pnand %p3486_p12, %p3279_p11  ;;  %p3494_p7 = por %p3493_p5, %p3492_p1 }
 0x8b6   : > { %p3488_p0 = pneg %p3487_p13 }
 0x8b8   : > { %p3495_p2 = pnand %p3494_p7, %p3488_p0 }
 0x8ba   : > { %3498 = shalt.err (!%p3495_p2)
}
 0x8bb   : > { %s3499_s20 = scalar_lea.hbm %s4477_s5, 256 }
 0x8bc   : > { %p3500_p8 = scmp.ne.s32.totalorder %s4477_s5, %s3499_s20  ;;  %p3505_p9 = scmp.lt.u32.totalorder %s3499_s20, %s4477_s5 }
 0x8be   : > { %p3501_p3 = pnand %p3500_p8, %p3279_p11 }
 0x8c0   : > { %p3502_p4 = pneg %p3501_p3 }
 0x8c2   : > { %p3507_p6 = pnand %p3505_p9, %p3502_p4 }
 0x8c4   : > { %3510 = shalt.err (!%p3507_p6)
}
 0x8c5   : > { %s3568_s30 = smov 128   ;;  %s3569_s7 = smov 8  }
 0x8c6   : > { %3261 = dma.vmem_to_hbm [thread:$0]  (%p3279_p11), %s2415_s16, 256, %s4477_s5, [#allocation8], %s3568_s30, %s3568_s30, %s3569_s7  }
 0x8c7   : > { %s3570_s8 = smov [#allocation12]  }
 0x8c8   : > { %s2427_s25 = sshll.u32 %s3570_s8, 4  ;;  %s2428_s25 = int_to_ptr.vmem [resolvable:$true] %s2427_s25 }
 0x8c9   : > { %s3511_s10 = scalar_lea.vmem %s2428_s25, 256  ;;  %p3518_p0 = scmp.lt.s32.totalorder %s2428_s25, %s2428_s25 }
 0x8ca   : > { %p3512_p10 = scmp.ne.s32.totalorder %s2428_s25, %s3511_s10  ;;  %p3519_p1 = scmp.lt.s32.totalorder %s3511_s10, %s3511_s10 }
 0x8cc   : > { %p3513_p12 = pnand %p3512_p10, %p3279_p11  ;;  %p3520_p5 = por %p3519_p1, %p3518_p0 }
 0x8ce   : > { %p3514_p13 = pneg %p3513_p12 }
 0x8d0   : > { %p3521_p7 = pnand %p3520_p5, %p3514_p13 }
 0x8d2   : > { %3524 = shalt.err (!%p3521_p7)
}
 0x8d3   : > { %s3525_s12 = scalar_lea.hbm %s4478_s6, 256 }
 0x8d4   : > { %p3526_p2 = scmp.ne.s32.totalorder %s4478_s6, %s3525_s12  ;;  %p3531_p4 = scmp.lt.u32.totalorder %s3525_s12, %s4478_s6 }
 0x8d6   : > { %p3527_p8 = pnand %p3526_p2, %p3279_p11 }
 0x8d8   : > { %p3528_p3 = pneg %p3527_p8 }
 0x8da   : > { %p3533_p9 = pnand %p3531_p4, %p3528_p3 }
 0x8dc   : > { %3536 = shalt.err (!%p3533_p9)
}
 0x8dd   : > { %3263 = dma.vmem_to_hbm [thread:$0]  (%p3279_p11), %s2428_s25, 256, %s4478_s6, [#allocation13], %s3568_s30, %s3568_s30, %s3569_s7  }
 0x8de   : > { %3550 = dma.done.wait (%p3279_p11), [#allocation8], 256  }
 0x8df   : > { %3552 = vsyncadd (%p3279_p11), [#allocation8], 4294967040 }
 0x8e0   : > { %3554 = dma.done.wait (%p3279_p11), [#allocation13], 256  }
 0x8e1   : > { %3556 = vsyncadd (%p3279_p11), [#allocation13], 4294967040 }
 0x8e2 PF: > { %s21_s21 = sadd.s32 1, %s3559_s21  }
 0x8e3   : > { %p18_p6 = scmp.ge.s32.totalorder %s21_s21, 4  }
 0x8e5   :  { %20 = sbr.rel (!%p18_p6) target bundleno = 4 (0x4), region = 103 }
 0x8ec   :  { %2447 = vsyncpa [#allocation7], 1 }
 0x8ed   :  { %2449 = vsyncpa [#allocation7 + $0x1], 1 }
 0x8ee   :  { %2450 = vsyncpa [#allocation10], 1 }
 0x8ef   :  { %2451 = vsyncpa [#allocation8], 1 }
 0x8f0   :  { %2453 = vsyncpa [#allocation8 + $0x1], 1 }
 0x8f1   :  { %2454 = vsyncpa [#allocation13], 1 }

</bundles_post_ra>
